<compile_context>
chip_gen: v5e
topology: v5e:2x2
jax: 0.10.0
libtpu: 0.0.40
codegen_flags: <defaults>
</compile_context>

<pallas_src>
import functools

import jax
import jax.numpy as jnp
from jax import lax
from jax.experimental import pallas as pl
from jax.experimental.pallas import tpu as pltpu

MID = 256  # hidden channel count fixed by the module definition


def _prediction_kernel(pos_ref, p_ref, w1_ref, b1_ref, w2_ref, b2_ref,
                       w3_ref, b3_ref, out_ref, vbuf_ref, *, H, W, pad):
    """Fused conv3x3+ReLU -> conv1x1+ReLU -> conv3x3+Sigmoid for ONE image.

    pos_ref : (2, HW) int32   row 0 = y index, row 1 = x index of each pixel
    p_ref   : (1, 9*Cin, HW)  im2col patches (pixels on lanes)
    w1_ref  : (256, 9*Cin)    conv1 weight, (out, ky*kx*cin)
    b1_ref  : (256, 1) f32
    w2_ref  : (256, 256)      conv2 weight, (out, in)
    b2_ref  : (256, 1) f32
    w3_ref  : (9, 256)        conv3 weight, row t=(3*ky+kx) holds w3[ky,kx,:,0]
    b3_ref  : (1,) f32 SMEM scalar
    out_ref : (1, 1, HW) f32  confidence map (lane-dense)
    vbuf_ref: VMEM scratch (9, HW + 2*pad) f32, lane-padded conv3 partials
    """
    HW = H * W
    cdt = w1_ref.dtype  # MXU input dtype (bf16 on the fast path)

    # ---- conv1: 3x3 pad=1 (Cin -> 256) as a single im2col matmul ----
    h1 = jnp.dot(w1_ref[...], p_ref[0], preferred_element_type=jnp.float32)
    h1 = jnp.maximum(h1 + b1_ref[...], 0.0)                     # (256, HW) f32

    # ---- conv2: 1x1 (256 -> 256) is a plain channel matmul ----
    h2 = jnp.dot(w2_ref[...], h1.astype(cdt),
                 preferred_element_type=jnp.float32)
    h2 = jnp.maximum(h2 + b2_ref[...], 0.0)                     # (256, HW) f32

    # ---- conv3: 3x3 pad=1 (256 -> 1) ----
    # One MXU pass produces per-tap partial sums v[t, p] = <w3[tap t], h2[:, p]>.
    v = jnp.dot(w3_ref[...], h2.astype(cdt),
                preferred_element_type=jnp.float32)             # (9, HW) f32

    # Stage into a lane-padded scratch so each tap's contribution is a cheap
    # shifted (and boundary-masked) slice read — this replaces the 3x3 spatial
    # stencil with padding=1 on a flattened pixel axis.
    vbuf_ref[...] = jnp.zeros(vbuf_ref.shape, vbuf_ref.dtype)
    vbuf_ref[:, pad:pad + HW] = v

    row = pos_ref[0:1, :]                                       # (1, HW) int32
    col = pos_ref[1:2, :]
    acc = jnp.zeros((1, HW), jnp.float32)
    for ky in range(3):
        for kx in range(3):
            dy, dx = ky - 1, kx - 1
            t = 3 * ky + kx
            off = dy * W + dx
            shifted = vbuf_ref[t:t + 1, pad + off:pad + off + HW]   # (1, HW)
            valid = ((row + dy >= 0) & (row + dy < H) &
                     (col + dx >= 0) & (col + dx < W))
            acc = acc + jnp.where(valid, shifted, 0.0)

    out_ref[0] = jax.nn.sigmoid(acc + b3_ref[0])


@functools.partial(jax.jit, static_argnames=("use_bf16",))
def prediction_module_forward(x_nchw, w1, b1, w2, b2, w3, b3, *, use_bf16=True):
    """x_nchw: (N, Cin, H, W) float32  ->  conf: (N, 1, H, W) float32."""
    N, Cin, H, W = x_nchw.shape
    HW = H * W
    K1 = 9 * Cin
    cdt = jnp.bfloat16 if use_bf16 else jnp.float32
    pad = ((W + 1 + 127) // 128) * 128  # lane-aligned halo for the conv3 stage

    # im2col with the 3x3 / pad=1 geometry folded in (layout plumbing only;
    # uses the NCHW input directly — no NHWC transpose needed).
    xp = jnp.pad(x_nchw, ((0, 0), (0, 0), (1, 1), (1, 1)))
    taps = [xp[:, :, ky:ky + H, kx:kx + W]
            for ky in range(3) for kx in range(3)]               # 9 x (N,Cin,H,W)
    patches = jnp.stack(taps, axis=1).reshape(N, K1, HW).astype(cdt)

    # Weights pre-transposed to (out, in) so pixels ride the lane dim.
    w1t = w1.reshape(K1, MID).T.astype(cdt)          # (256, 9*Cin)
    w2t = w2.T.astype(cdt)                           # (256, 256)
    w3t = w3.reshape(9, MID).astype(cdt)             # (9, 256)
    b1c = b1.reshape(MID, 1).astype(jnp.float32)
    b2c = b2.reshape(MID, 1).astype(jnp.float32)
    b3c = b3.reshape(1).astype(jnp.float32)

    pix = jnp.arange(HW, dtype=jnp.int32)
    pos = jnp.stack([pix // W, pix % W]).astype(jnp.int32)       # (2, HW)

    kernel = functools.partial(_prediction_kernel, H=H, W=W, pad=pad)

    conf = pl.pallas_call(
        kernel,
        out_shape=jax.ShapeDtypeStruct((N, 1, HW), jnp.float32),
        grid_spec=pltpu.PrefetchScalarGridSpec(
            num_scalar_prefetch=0,
            grid=(N,),
            in_specs=[
                pl.BlockSpec((2, HW), lambda n: (0, 0)),             # pos
                pl.BlockSpec((1, K1, HW), lambda n: (n, 0, 0)),      # patches
                pl.BlockSpec((MID, K1), lambda n: (0, 0)),           # w1t
                pl.BlockSpec((MID, 1), lambda n: (0, 0)),            # b1
                pl.BlockSpec((MID, MID), lambda n: (0, 0)),          # w2t
                pl.BlockSpec((MID, 1), lambda n: (0, 0)),            # b2
                pl.BlockSpec((9, MID), lambda n: (0, 0)),            # w3t
                pl.BlockSpec(memory_space=pltpu.MemorySpace.SMEM),   # b3 scalar
            ],
            out_specs=pl.BlockSpec((1, 1, HW), lambda n: (n, 0, 0)),
            scratch_shapes=[pltpu.VMEM((9, HW + 2 * pad), jnp.float32)],
        ),
        compiler_params=pltpu.CompilerParams(
            dimension_semantics=("parallel",)),
    )(pos, patches, w1t, b1c, w2t, b2c, w3t, b3c)

    return conf.reshape(N, 1, H, W)


def _reference_forward(x_nchw, w1, b1, w2, b2, w3, b3):
    """Pure-JAX f32 reference (lax conv) matching the PyTorch module."""
    x = jnp.transpose(x_nchw, (0, 2, 3, 1))
    dn = ("NHWC", "HWIO", "NHWC")
    y = lax.conv_general_dilated(x, w1, (1, 1), "SAME", dimension_numbers=dn)
    y = jax.nn.relu(y + b1.reshape(1, 1, 1, -1))
    y = jax.nn.relu(jnp.einsum("nhwc,co->nhwo", y, w2) + b2.reshape(1, 1, 1, -1))
    y = lax.conv_general_dilated(y, w3, (1, 1), "SAME", dimension_numbers=dn)
    y = jax.nn.sigmoid(y + b3.reshape(1, 1, 1, -1))
    return jnp.transpose(y, (0, 3, 1, 2))


def _init_params(key, input_channels):
    """Deterministic parameter init (fan-in scaled normals), HWIO layouts."""
    k = jax.random.split(key, 6)
    w1 = jax.random.normal(k[0], (3, 3, input_channels, MID), jnp.float32)
    w1 = w1 / jnp.sqrt(9.0 * input_channels)
    b1 = 0.01 * jax.random.normal(k[1], (MID,), jnp.float32)
    w2 = jax.random.normal(k[2], (MID, MID), jnp.float32) / jnp.sqrt(float(MID))
    b2 = 0.01 * jax.random.normal(k[3], (MID,), jnp.float32)
    w3 = jax.random.normal(k[4], (3, 3, MID, 1), jnp.float32) / jnp.sqrt(9.0 * MID)
    b3 = 0.01 * jax.random.normal(k[5], (1,), jnp.float32)
    return w1, b1, w2, b2, w3, b3


if __name__ == "__main__":
    key = jax.random.PRNGKey(0)
    k_x, k_p = jax.random.split(key)

    N, Cin, H, W = 2, 4, 16, 16
    x = jax.random.normal(k_x, (N, Cin, H, W), jnp.float32)
    params = _init_params(k_p, Cin)

    ref = jax.block_until_ready(_reference_forward(x, *params))

    # Strict structural check: f32 matmul path vs f32 lax.conv reference.
    conf_f32 = jax.block_until_ready(
        prediction_module_forward(x, *params, use_bf16=False))
    assert conf_f32.shape == (N, 1, H, W), conf_f32.shape
    assert jnp.allclose(conf_f32, ref, rtol=2e-4, atol=2e-4), (
        float(jnp.max(jnp.abs(conf_f32 - ref))))

    # Fast bf16-MXU path (production default); looser tolerance vs f32 ref.
    conf = jax.block_until_ready(prediction_module_forward(x, *params))
    assert conf.shape == (N, 1, H, W), conf.shape
    assert jnp.allclose(conf, ref, rtol=0.0, atol=2.5e-2), (
        float(jnp.max(jnp.abs(conf - ref))))

    print("KERNEL_OK")
</pallas_src>

<mosaic_0001>
module attributes {stable_mosaic.version = 11 : i64} {
  func.func @_prediction_kernel(%arg0: i32, %arg1: memref<2x256xi32, #tpu.memory_space<vmem>>, %arg2: memref<1x36x256xf32, #tpu.memory_space<vmem>>, %arg3: memref<256x36xf32, #tpu.memory_space<vmem>>, %arg4: memref<256x1xf32, #tpu.memory_space<vmem>>, %arg5: memref<256x256xf32, #tpu.memory_space<vmem>>, %arg6: memref<256x1xf32, #tpu.memory_space<vmem>>, %arg7: memref<9x256xf32, #tpu.memory_space<vmem>>, %arg8: memref<1xf32, #tpu.memory_space<smem>>, %arg9: memref<1x1x256xf32, #tpu.memory_space<vmem>>, %arg10: memref<9x512xf32, #tpu.memory_space<vmem>>) attributes {dimension_semantics = [#tpu.dimension_semantics<parallel>], iteration_bounds = array<i64: 2>, scalar_prefetch = 0 : i64, scratch_operands = 1 : i64, tpu.core_type = #tpu.core_type<tc>, window_params = [{pipeline_mode = #tpu.pipeline_mode<synchronous>, transform_indices = @transform_0, window_bounds = array<i64: 2, 256>}, {transform_indices = @transform_1, window_bounds = array<i64: 1, 36, 256>}, {pipeline_mode = #tpu.pipeline_mode<synchronous>, transform_indices = @transform_2, window_bounds = array<i64: 256, 36>}, {pipeline_mode = #tpu.pipeline_mode<synchronous>, transform_indices = @transform_3, window_bounds = array<i64: 256, 1>}, {pipeline_mode = #tpu.pipeline_mode<synchronous>, transform_indices = @transform_4, window_bounds = array<i64: 256, 256>}, {pipeline_mode = #tpu.pipeline_mode<synchronous>, transform_indices = @transform_5, window_bounds = array<i64: 256, 1>}, {pipeline_mode = #tpu.pipeline_mode<synchronous>, transform_indices = @transform_6, window_bounds = array<i64: 9, 256>}, {transform_indices = @transform_7, window_bounds = array<i64: 1>}, {transform_indices = @transform_8, window_bounds = array<i64: 1, 1, 256>}]} {
    %c0 = arith.constant 0 : index
    %c0_0 = arith.constant 0 : index
    %0 = vector.load %arg3[%c0, %c0_0] : memref<256x36xf32, #tpu.memory_space<vmem>>, vector<256x36xf32>
    %c0_1 = arith.constant 0 : index
    %c0_2 = arith.constant 0 : index
    %c0_3 = arith.constant 0 : index
    %1 = vector.load %arg2[%c0_1, %c0_2, %c0_3] : memref<1x36x256xf32, #tpu.memory_space<vmem>>, vector<1x36x256xf32>
    %2 = vector.shape_cast %1 : vector<1x36x256xf32> to vector<36x256xf32>
    %cst = arith.constant dense<0.000000e+00> : vector<256x256xf32>
    %3 = tpu.matmul %0, %2, %cst {dimension_numbers = #tpu.dot_dimension_numbers<[1], [0], [0], [1], [0, 0, 1, 1], [], []>} : vector<256x36xf32>, vector<36x256xf32>, vector<256x256xf32> -> vector<256x256xf32>
    %c0_4 = arith.constant 0 : index
    %c0_5 = arith.constant 0 : index
    %4 = vector.load %arg4[%c0_4, %c0_5] : memref<256x1xf32, #tpu.memory_space<vmem>>, vector<256x1xf32>
    %5 = vector.broadcast %4 : vector<256x1xf32> to vector<256x256xf32>
    %6 = arith.addf %3, %5 : vector<256x256xf32>
    %cst_6 = arith.constant 0.000000e+00 : f32
    %7 = vector.broadcast %cst_6 : f32 to vector<256x256xf32>
    %8 = arith.maximumf %6, %7 : vector<256x256xf32>
    %c0_7 = arith.constant 0 : index
    %c0_8 = arith.constant 0 : index
    %9 = vector.load %arg5[%c0_7, %c0_8] : memref<256x256xf32, #tpu.memory_space<vmem>>, vector<256x256xf32>
    %cst_9 = arith.constant dense<0.000000e+00> : vector<256x256xf32>
    %10 = tpu.matmul %9, %8, %cst_9 {dimension_numbers = #tpu.dot_dimension_numbers<[1], [0], [0], [1], [0, 0, 1, 1], [], []>} : vector<256x256xf32>, vector<256x256xf32>, vector<256x256xf32> -> vector<256x256xf32>
    %c0_10 = arith.constant 0 : index
    %c0_11 = arith.constant 0 : index
    %11 = vector.load %arg6[%c0_10, %c0_11] : memref<256x1xf32, #tpu.memory_space<vmem>>, vector<256x1xf32>
    %12 = vector.broadcast %11 : vector<256x1xf32> to vector<256x256xf32>
    %13 = arith.addf %10, %12 : vector<256x256xf32>
    %cst_12 = arith.constant 0.000000e+00 : f32
    %14 = vector.broadcast %cst_12 : f32 to vector<256x256xf32>
    %15 = arith.maximumf %13, %14 : vector<256x256xf32>
    %c0_13 = arith.constant 0 : index
    %c0_14 = arith.constant 0 : index
    %16 = vector.load %arg7[%c0_13, %c0_14] : memref<9x256xf32, #tpu.memory_space<vmem>>, vector<9x256xf32>
    %cst_15 = arith.constant dense<0.000000e+00> : vector<9x256xf32>
    %17 = tpu.matmul %16, %15, %cst_15 {dimension_numbers = #tpu.dot_dimension_numbers<[1], [0], [0], [1], [0, 0, 1, 1], [], []>} : vector<9x256xf32>, vector<256x256xf32>, vector<9x256xf32> -> vector<9x256xf32>
    %cst_16 = arith.constant 0.000000e+00 : f32
    %18 = vector.broadcast %cst_16 : f32 to vector<9x512xf32>
    %c0_17 = arith.constant 0 : index
    %c0_18 = arith.constant 0 : index
    %19 = vector.load %arg10[%c0_17, %c0_18] : memref<9x512xf32, #tpu.memory_space<vmem>>, vector<9x512xf32>
    tpu.vector_store %arg10[%c0_17, %c0_18], %18 {strides = array<i32>} : memref<9x512xf32, #tpu.memory_space<vmem>>, vector<9x512xf32>,
    %c0_19 = arith.constant 0 : index
    %c128 = arith.constant 128 : index
    %20 = vector.load %arg10[%c0_19, %c128] : memref<9x512xf32, #tpu.memory_space<vmem>>, vector<9x256xf32>
    tpu.vector_store %arg10[%c0_19, %c128], %17 {strides = array<i32>} : memref<9x512xf32, #tpu.memory_space<vmem>>, vector<9x256xf32>,
    %c0_20 = arith.constant 0 : index
    %c0_21 = arith.constant 0 : index
    %21 = vector.load %arg1[%c0_20, %c0_21] : memref<2x256xi32, #tpu.memory_space<vmem>>, vector<1x256xi32>
    %c1 = arith.constant 1 : index
    %c0_22 = arith.constant 0 : index
    %22 = vector.load %arg1[%c1, %c0_22] : memref<2x256xi32, #tpu.memory_space<vmem>>, vector<1x256xi32>
    %cst_23 = arith.constant 0.000000e+00 : f32
    %23 = vector.broadcast %cst_23 : f32 to vector<1x256xf32>
    %c0_24 = arith.constant 0 : index
    %c111 = arith.constant 111 : index
    %24 = vector.load %arg10[%c0_24, %c111] : memref<9x512xf32, #tpu.memory_space<vmem>>, vector<1x256xf32>
    %c-1_i32 = arith.constant -1 : i32
    %25 = vector.broadcast %c-1_i32 : i32 to vector<1x256xi32>
    %26 = arith.addi %21, %25 : vector<1x256xi32>
    %c0_i32 = arith.constant 0 : i32
    %27 = vector.broadcast %c0_i32 : i32 to vector<1x256xi32>
    %28 = arith.cmpi sge, %26, %27 : vector<1x256xi32>
    %c-1_i32_25 = arith.constant -1 : i32
    %29 = vector.broadcast %c-1_i32_25 : i32 to vector<1x256xi32>
    %30 = arith.addi %21, %29 : vector<1x256xi32>
    %c16_i32 = arith.constant 16 : i32
    %31 = vector.broadcast %c16_i32 : i32 to vector<1x256xi32>
    %32 = arith.cmpi slt, %30, %31 : vector<1x256xi32>
    %33 = arith.andi %28, %32 : vector<1x256xi1>
    %c-1_i32_26 = arith.constant -1 : i32
    %34 = vector.broadcast %c-1_i32_26 : i32 to vector<1x256xi32>
    %35 = arith.addi %22, %34 : vector<1x256xi32>
    %c0_i32_27 = arith.constant 0 : i32
    %36 = vector.broadcast %c0_i32_27 : i32 to vector<1x256xi32>
    %37 = arith.cmpi sge, %35, %36 : vector<1x256xi32>
    %38 = arith.andi %33, %37 : vector<1x256xi1>
    %c-1_i32_28 = arith.constant -1 : i32
    %39 = vector.broadcast %c-1_i32_28 : i32 to vector<1x256xi32>
    %40 = arith.addi %22, %39 : vector<1x256xi32>
    %c16_i32_29 = arith.constant 16 : i32
    %41 = vector.broadcast %c16_i32_29 : i32 to vector<1x256xi32>
    %42 = arith.cmpi slt, %40, %41 : vector<1x256xi32>
    %43 = arith.andi %38, %42 : vector<1x256xi1>
    %cst_30 = arith.constant 0.000000e+00 : f32
    %44 = vector.broadcast %cst_30 : f32 to vector<1x256xf32>
    %45 = arith.select %43, %24, %44 : vector<1x256xi1>, vector<1x256xf32>
    %46 = arith.addf %23, %45 : vector<1x256xf32>
    %c1_31 = arith.constant 1 : index
    %c112 = arith.constant 112 : index
    %47 = vector.load %arg10[%c1_31, %c112] : memref<9x512xf32, #tpu.memory_space<vmem>>, vector<1x256xf32>
    %c-1_i32_32 = arith.constant -1 : i32
    %48 = vector.broadcast %c-1_i32_32 : i32 to vector<1x256xi32>
    %49 = arith.addi %21, %48 : vector<1x256xi32>
    %c0_i32_33 = arith.constant 0 : i32
    %50 = vector.broadcast %c0_i32_33 : i32 to vector<1x256xi32>
    %51 = arith.cmpi sge, %49, %50 : vector<1x256xi32>
    %c-1_i32_34 = arith.constant -1 : i32
    %52 = vector.broadcast %c-1_i32_34 : i32 to vector<1x256xi32>
    %53 = arith.addi %21, %52 : vector<1x256xi32>
    %c16_i32_35 = arith.constant 16 : i32
    %54 = vector.broadcast %c16_i32_35 : i32 to vector<1x256xi32>
    %55 = arith.cmpi slt, %53, %54 : vector<1x256xi32>
    %56 = arith.andi %51, %55 : vector<1x256xi1>
    %c0_i32_36 = arith.constant 0 : i32
    %57 = vector.broadcast %c0_i32_36 : i32 to vector<1x256xi32>
    %58 = arith.addi %22, %57 : vector<1x256xi32>
    %c0_i32_37 = arith.constant 0 : i32
    %59 = vector.broadcast %c0_i32_37 : i32 to vector<1x256xi32>
    %60 = arith.cmpi sge, %58, %59 : vector<1x256xi32>
    %61 = arith.andi %56, %60 : vector<1x256xi1>
    %c0_i32_38 = arith.constant 0 : i32
    %62 = vector.broadcast %c0_i32_38 : i32 to vector<1x256xi32>
    %63 = arith.addi %22, %62 : vector<1x256xi32>
    %c16_i32_39 = arith.constant 16 : i32
    %64 = vector.broadcast %c16_i32_39 : i32 to vector<1x256xi32>
    %65 = arith.cmpi slt, %63, %64 : vector<1x256xi32>
    %66 = arith.andi %61, %65 : vector<1x256xi1>
    %cst_40 = arith.constant 0.000000e+00 : f32
    %67 = vector.broadcast %cst_40 : f32 to vector<1x256xf32>
    %68 = arith.select %66, %47, %67 : vector<1x256xi1>, vector<1x256xf32>
    %69 = arith.addf %46, %68 : vector<1x256xf32>
    %c2 = arith.constant 2 : index
    %c113 = arith.constant 113 : index
    %70 = vector.load %arg10[%c2, %c113] : memref<9x512xf32, #tpu.memory_space<vmem>>, vector<1x256xf32>
    %c-1_i32_41 = arith.constant -1 : i32
    %71 = vector.broadcast %c-1_i32_41 : i32 to vector<1x256xi32>
    %72 = arith.addi %21, %71 : vector<1x256xi32>
    %c0_i32_42 = arith.constant 0 : i32
    %73 = vector.broadcast %c0_i32_42 : i32 to vector<1x256xi32>
    %74 = arith.cmpi sge, %72, %73 : vector<1x256xi32>
    %c-1_i32_43 = arith.constant -1 : i32
    %75 = vector.broadcast %c-1_i32_43 : i32 to vector<1x256xi32>
    %76 = arith.addi %21, %75 : vector<1x256xi32>
    %c16_i32_44 = arith.constant 16 : i32
    %77 = vector.broadcast %c16_i32_44 : i32 to vector<1x256xi32>
    %78 = arith.cmpi slt, %76, %77 : vector<1x256xi32>
    %79 = arith.andi %74, %78 : vector<1x256xi1>
    %c1_i32 = arith.constant 1 : i32
    %80 = vector.broadcast %c1_i32 : i32 to vector<1x256xi32>
    %81 = arith.addi %22, %80 : vector<1x256xi32>
    %c0_i32_45 = arith.constant 0 : i32
    %82 = vector.broadcast %c0_i32_45 : i32 to vector<1x256xi32>
    %83 = arith.cmpi sge, %81, %82 : vector<1x256xi32>
    %84 = arith.andi %79, %83 : vector<1x256xi1>
    %c1_i32_46 = arith.constant 1 : i32
    %85 = vector.broadcast %c1_i32_46 : i32 to vector<1x256xi32>
    %86 = arith.addi %22, %85 : vector<1x256xi32>
    %c16_i32_47 = arith.constant 16 : i32
    %87 = vector.broadcast %c16_i32_47 : i32 to vector<1x256xi32>
    %88 = arith.cmpi slt, %86, %87 : vector<1x256xi32>
    %89 = arith.andi %84, %88 : vector<1x256xi1>
    %cst_48 = arith.constant 0.000000e+00 : f32
    %90 = vector.broadcast %cst_48 : f32 to vector<1x256xf32>
    %91 = arith.select %89, %70, %90 : vector<1x256xi1>, vector<1x256xf32>
    %92 = arith.addf %69, %91 : vector<1x256xf32>
    %c3 = arith.constant 3 : index
    %c127 = arith.constant 127 : index
    %93 = vector.load %arg10[%c3, %c127] : memref<9x512xf32, #tpu.memory_space<vmem>>, vector<1x256xf32>
    %c0_i32_49 = arith.constant 0 : i32
    %94 = vector.broadcast %c0_i32_49 : i32 to vector<1x256xi32>
    %95 = arith.addi %21, %94 : vector<1x256xi32>
    %c0_i32_50 = arith.constant 0 : i32
    %96 = vector.broadcast %c0_i32_50 : i32 to vector<1x256xi32>
    %97 = arith.cmpi sge, %95, %96 : vector<1x256xi32>
    %c0_i32_51 = arith.constant 0 : i32
    %98 = vector.broadcast %c0_i32_51 : i32 to vector<1x256xi32>
    %99 = arith.addi %21, %98 : vector<1x256xi32>
    %c16_i32_52 = arith.constant 16 : i32
    %100 = vector.broadcast %c16_i32_52 : i32 to vector<1x256xi32>
    %101 = arith.cmpi slt, %99, %100 : vector<1x256xi32>
    %102 = arith.andi %97, %101 : vector<1x256xi1>
    %c-1_i32_53 = arith.constant -1 : i32
    %103 = vector.broadcast %c-1_i32_53 : i32 to vector<1x256xi32>
    %104 = arith.addi %22, %103 : vector<1x256xi32>
    %c0_i32_54 = arith.constant 0 : i32
    %105 = vector.broadcast %c0_i32_54 : i32 to vector<1x256xi32>
    %106 = arith.cmpi sge, %104, %105 : vector<1x256xi32>
    %107 = arith.andi %102, %106 : vector<1x256xi1>
    %c-1_i32_55 = arith.constant -1 : i32
    %108 = vector.broadcast %c-1_i32_55 : i32 to vector<1x256xi32>
    %109 = arith.addi %22, %108 : vector<1x256xi32>
    %c16_i32_56 = arith.constant 16 : i32
    %110 = vector.broadcast %c16_i32_56 : i32 to vector<1x256xi32>
    %111 = arith.cmpi slt, %109, %110 : vector<1x256xi32>
    %112 = arith.andi %107, %111 : vector<1x256xi1>
    %cst_57 = arith.constant 0.000000e+00 : f32
    %113 = vector.broadcast %cst_57 : f32 to vector<1x256xf32>
    %114 = arith.select %112, %93, %113 : vector<1x256xi1>, vector<1x256xf32>
    %115 = arith.addf %92, %114 : vector<1x256xf32>
    %c4 = arith.constant 4 : index
    %c128_58 = arith.constant 128 : index
    %116 = vector.load %arg10[%c4, %c128_58] : memref<9x512xf32, #tpu.memory_space<vmem>>, vector<1x256xf32>
    %c0_i32_59 = arith.constant 0 : i32
    %117 = vector.broadcast %c0_i32_59 : i32 to vector<1x256xi32>
    %118 = arith.addi %21, %117 : vector<1x256xi32>
    %c0_i32_60 = arith.constant 0 : i32
    %119 = vector.broadcast %c0_i32_60 : i32 to vector<1x256xi32>
    %120 = arith.cmpi sge, %118, %119 : vector<1x256xi32>
    %c0_i32_61 = arith.constant 0 : i32
    %121 = vector.broadcast %c0_i32_61 : i32 to vector<1x256xi32>
    %122 = arith.addi %21, %121 : vector<1x256xi32>
    %c16_i32_62 = arith.constant 16 : i32
    %123 = vector.broadcast %c16_i32_62 : i32 to vector<1x256xi32>
    %124 = arith.cmpi slt, %122, %123 : vector<1x256xi32>
    %125 = arith.andi %120, %124 : vector<1x256xi1>
    %c0_i32_63 = arith.constant 0 : i32
    %126 = vector.broadcast %c0_i32_63 : i32 to vector<1x256xi32>
    %127 = arith.addi %22, %126 : vector<1x256xi32>
    %c0_i32_64 = arith.constant 0 : i32
    %128 = vector.broadcast %c0_i32_64 : i32 to vector<1x256xi32>
    %129 = arith.cmpi sge, %127, %128 : vector<1x256xi32>
    %130 = arith.andi %125, %129 : vector<1x256xi1>
    %c0_i32_65 = arith.constant 0 : i32
    %131 = vector.broadcast %c0_i32_65 : i32 to vector<1x256xi32>
    %132 = arith.addi %22, %131 : vector<1x256xi32>
    %c16_i32_66 = arith.constant 16 : i32
    %133 = vector.broadcast %c16_i32_66 : i32 to vector<1x256xi32>
    %134 = arith.cmpi slt, %132, %133 : vector<1x256xi32>
    %135 = arith.andi %130, %134 : vector<1x256xi1>
    %cst_67 = arith.constant 0.000000e+00 : f32
    %136 = vector.broadcast %cst_67 : f32 to vector<1x256xf32>
    %137 = arith.select %135, %116, %136 : vector<1x256xi1>, vector<1x256xf32>
    %138 = arith.addf %115, %137 : vector<1x256xf32>
    %c5 = arith.constant 5 : index
    %c129 = arith.constant 129 : index
    %139 = vector.load %arg10[%c5, %c129] : memref<9x512xf32, #tpu.memory_space<vmem>>, vector<1x256xf32>
    %c0_i32_68 = arith.constant 0 : i32
    %140 = vector.broadcast %c0_i32_68 : i32 to vector<1x256xi32>
    %141 = arith.addi %21, %140 : vector<1x256xi32>
    %c0_i32_69 = arith.constant 0 : i32
    %142 = vector.broadcast %c0_i32_69 : i32 to vector<1x256xi32>
    %143 = arith.cmpi sge, %141, %142 : vector<1x256xi32>
    %c0_i32_70 = arith.constant 0 : i32
    %144 = vector.broadcast %c0_i32_70 : i32 to vector<1x256xi32>
    %145 = arith.addi %21, %144 : vector<1x256xi32>
    %c16_i32_71 = arith.constant 16 : i32
    %146 = vector.broadcast %c16_i32_71 : i32 to vector<1x256xi32>
    %147 = arith.cmpi slt, %145, %146 : vector<1x256xi32>
    %148 = arith.andi %143, %147 : vector<1x256xi1>
    %c1_i32_72 = arith.constant 1 : i32
    %149 = vector.broadcast %c1_i32_72 : i32 to vector<1x256xi32>
    %150 = arith.addi %22, %149 : vector<1x256xi32>
    %c0_i32_73 = arith.constant 0 : i32
    %151 = vector.broadcast %c0_i32_73 : i32 to vector<1x256xi32>
    %152 = arith.cmpi sge, %150, %151 : vector<1x256xi32>
    %153 = arith.andi %148, %152 : vector<1x256xi1>
    %c1_i32_74 = arith.constant 1 : i32
    %154 = vector.broadcast %c1_i32_74 : i32 to vector<1x256xi32>
    %155 = arith.addi %22, %154 : vector<1x256xi32>
    %c16_i32_75 = arith.constant 16 : i32
    %156 = vector.broadcast %c16_i32_75 : i32 to vector<1x256xi32>
    %157 = arith.cmpi slt, %155, %156 : vector<1x256xi32>
    %158 = arith.andi %153, %157 : vector<1x256xi1>
    %cst_76 = arith.constant 0.000000e+00 : f32
    %159 = vector.broadcast %cst_76 : f32 to vector<1x256xf32>
    %160 = arith.select %158, %139, %159 : vector<1x256xi1>, vector<1x256xf32>
    %161 = arith.addf %138, %160 : vector<1x256xf32>
    %c6 = arith.constant 6 : index
    %c143 = arith.constant 143 : index
    %162 = vector.load %arg10[%c6, %c143] : memref<9x512xf32, #tpu.memory_space<vmem>>, vector<1x256xf32>
    %c1_i32_77 = arith.constant 1 : i32
    %163 = vector.broadcast %c1_i32_77 : i32 to vector<1x256xi32>
    %164 = arith.addi %21, %163 : vector<1x256xi32>
    %c0_i32_78 = arith.constant 0 : i32
    %165 = vector.broadcast %c0_i32_78 : i32 to vector<1x256xi32>
    %166 = arith.cmpi sge, %164, %165 : vector<1x256xi32>
    %c1_i32_79 = arith.constant 1 : i32
    %167 = vector.broadcast %c1_i32_79 : i32 to vector<1x256xi32>
    %168 = arith.addi %21, %167 : vector<1x256xi32>
    %c16_i32_80 = arith.constant 16 : i32
    %169 = vector.broadcast %c16_i32_80 : i32 to vector<1x256xi32>
    %170 = arith.cmpi slt, %168, %169 : vector<1x256xi32>
    %171 = arith.andi %166, %170 : vector<1x256xi1>
    %c-1_i32_81 = arith.constant -1 : i32
    %172 = vector.broadcast %c-1_i32_81 : i32 to vector<1x256xi32>
    %173 = arith.addi %22, %172 : vector<1x256xi32>
    %c0_i32_82 = arith.constant 0 : i32
    %174 = vector.broadcast %c0_i32_82 : i32 to vector<1x256xi32>
    %175 = arith.cmpi sge, %173, %174 : vector<1x256xi32>
    %176 = arith.andi %171, %175 : vector<1x256xi1>
    %c-1_i32_83 = arith.constant -1 : i32
    %177 = vector.broadcast %c-1_i32_83 : i32 to vector<1x256xi32>
    %178 = arith.addi %22, %177 : vector<1x256xi32>
    %c16_i32_84 = arith.constant 16 : i32
    %179 = vector.broadcast %c16_i32_84 : i32 to vector<1x256xi32>
    %180 = arith.cmpi slt, %178, %179 : vector<1x256xi32>
    %181 = arith.andi %176, %180 : vector<1x256xi1>
    %cst_85 = arith.constant 0.000000e+00 : f32
    %182 = vector.broadcast %cst_85 : f32 to vector<1x256xf32>
    %183 = arith.select %181, %162, %182 : vector<1x256xi1>, vector<1x256xf32>
    %184 = arith.addf %161, %183 : vector<1x256xf32>
    %c7 = arith.constant 7 : index
    %c144 = arith.constant 144 : index
    %185 = vector.load %arg10[%c7, %c144] : memref<9x512xf32, #tpu.memory_space<vmem>>, vector<1x256xf32>
    %c1_i32_86 = arith.constant 1 : i32
    %186 = vector.broadcast %c1_i32_86 : i32 to vector<1x256xi32>
    %187 = arith.addi %21, %186 : vector<1x256xi32>
    %c0_i32_87 = arith.constant 0 : i32
    %188 = vector.broadcast %c0_i32_87 : i32 to vector<1x256xi32>
    %189 = arith.cmpi sge, %187, %188 : vector<1x256xi32>
    %c1_i32_88 = arith.constant 1 : i32
    %190 = vector.broadcast %c1_i32_88 : i32 to vector<1x256xi32>
    %191 = arith.addi %21, %190 : vector<1x256xi32>
    %c16_i32_89 = arith.constant 16 : i32
    %192 = vector.broadcast %c16_i32_89 : i32 to vector<1x256xi32>
    %193 = arith.cmpi slt, %191, %192 : vector<1x256xi32>
    %194 = arith.andi %189, %193 : vector<1x256xi1>
    %c0_i32_90 = arith.constant 0 : i32
    %195 = vector.broadcast %c0_i32_90 : i32 to vector<1x256xi32>
    %196 = arith.addi %22, %195 : vector<1x256xi32>
    %c0_i32_91 = arith.constant 0 : i32
    %197 = vector.broadcast %c0_i32_91 : i32 to vector<1x256xi32>
    %198 = arith.cmpi sge, %196, %197 : vector<1x256xi32>
    %199 = arith.andi %194, %198 : vector<1x256xi1>
    %c0_i32_92 = arith.constant 0 : i32
    %200 = vector.broadcast %c0_i32_92 : i32 to vector<1x256xi32>
    %201 = arith.addi %22, %200 : vector<1x256xi32>
    %c16_i32_93 = arith.constant 16 : i32
    %202 = vector.broadcast %c16_i32_93 : i32 to vector<1x256xi32>
    %203 = arith.cmpi slt, %201, %202 : vector<1x256xi32>
    %204 = arith.andi %199, %203 : vector<1x256xi1>
    %cst_94 = arith.constant 0.000000e+00 : f32
    %205 = vector.broadcast %cst_94 : f32 to vector<1x256xf32>
    %206 = arith.select %204, %185, %205 : vector<1x256xi1>, vector<1x256xf32>
    %207 = arith.addf %184, %206 : vector<1x256xf32>
    %c8 = arith.constant 8 : index
    %c145 = arith.constant 145 : index
    %208 = vector.load %arg10[%c8, %c145] : memref<9x512xf32, #tpu.memory_space<vmem>>, vector<1x256xf32>
    %c1_i32_95 = arith.constant 1 : i32
    %209 = vector.broadcast %c1_i32_95 : i32 to vector<1x256xi32>
    %210 = arith.addi %21, %209 : vector<1x256xi32>
    %c0_i32_96 = arith.constant 0 : i32
    %211 = vector.broadcast %c0_i32_96 : i32 to vector<1x256xi32>
    %212 = arith.cmpi sge, %210, %211 : vector<1x256xi32>
    %c1_i32_97 = arith.constant 1 : i32
    %213 = vector.broadcast %c1_i32_97 : i32 to vector<1x256xi32>
    %214 = arith.addi %21, %213 : vector<1x256xi32>
    %c16_i32_98 = arith.constant 16 : i32
    %215 = vector.broadcast %c16_i32_98 : i32 to vector<1x256xi32>
    %216 = arith.cmpi slt, %214, %215 : vector<1x256xi32>
    %217 = arith.andi %212, %216 : vector<1x256xi1>
    %c1_i32_99 = arith.constant 1 : i32
    %218 = vector.broadcast %c1_i32_99 : i32 to vector<1x256xi32>
    %219 = arith.addi %22, %218 : vector<1x256xi32>
    %c0_i32_100 = arith.constant 0 : i32
    %220 = vector.broadcast %c0_i32_100 : i32 to vector<1x256xi32>
    %221 = arith.cmpi sge, %219, %220 : vector<1x256xi32>
    %222 = arith.andi %217, %221 : vector<1x256xi1>
    %c1_i32_101 = arith.constant 1 : i32
    %223 = vector.broadcast %c1_i32_101 : i32 to vector<1x256xi32>
    %224 = arith.addi %22, %223 : vector<1x256xi32>
    %c16_i32_102 = arith.constant 16 : i32
    %225 = vector.broadcast %c16_i32_102 : i32 to vector<1x256xi32>
    %226 = arith.cmpi slt, %224, %225 : vector<1x256xi32>
    %227 = arith.andi %222, %226 : vector<1x256xi1>
    %cst_103 = arith.constant 0.000000e+00 : f32
    %228 = vector.broadcast %cst_103 : f32 to vector<1x256xf32>
    %229 = arith.select %227, %208, %228 : vector<1x256xi1>, vector<1x256xf32>
    %230 = arith.addf %207, %229 : vector<1x256xf32>
    %c0_104 = arith.constant 0 : index
    %231 = memref.load %arg8[%c0_104] : memref<1xf32, #tpu.memory_space<smem>>
    %232 = vector.broadcast %231 : f32 to vector<1x256xf32>
    %233 = arith.addf %230, %232 : vector<1x256xf32>
    %234 = arith.negf %233 : vector<1x256xf32>
    %235 = math.exp %234 : vector<1x256xf32>
    %cst_105 = arith.constant 1.000000e+00 : f32
    %236 = vector.broadcast %cst_105 : f32 to vector<1x256xf32>
    %237 = arith.addf %236, %235 : vector<1x256xf32>
    %238 = arith.divf %236, %237 : vector<1x256xf32>
    %c0_106 = arith.constant 0 : index
    %c0_107 = arith.constant 0 : index
    %c0_108 = arith.constant 0 : index
    %239 = vector.load %arg9[%c0_106, %c0_107, %c0_108] : memref<1x1x256xf32, #tpu.memory_space<vmem>>, vector<1x1x256xf32>
    %240 = vector.shape_cast %239 : vector<1x1x256xf32> to vector<1x256xf32>
    %241 = vector.shape_cast %238 : vector<1x256xf32> to vector<1x1x256xf32>
    tpu.vector_store %arg9[%c0_106, %c0_107, %c0_108], %241 {strides = array<i32>} : memref<1x1x256xf32, #tpu.memory_space<vmem>>, vector<1x1x256xf32>,
    return
  }
  func.func @transform_0(%arg0: i32) -> (i32, i32) {
    %c0_i32 = arith.constant 0 : i32
    %c0_i32_0 = arith.constant 0 : i32
    %c0_i32_1 = arith.constant 0 : i32
    return %c0_i32, %c0_i32_0 : i32, i32
  }
  func.func @transform_1(%arg0: i32) -> (i32, i32, i32) {
    %c0_i32 = arith.constant 0 : i32
    %c0_i32_0 = arith.constant 0 : i32
    %c0_i32_1 = arith.constant 0 : i32
    return %arg0, %c0_i32, %c0_i32_0 : i32, i32, i32
  }
  func.func @transform_2(%arg0: i32) -> (i32, i32) {
    %c0_i32 = arith.constant 0 : i32
    %c0_i32_0 = arith.constant 0 : i32
    %c0_i32_1 = arith.constant 0 : i32
    return %c0_i32, %c0_i32_0 : i32, i32
  }
  func.func @transform_3(%arg0: i32) -> (i32, i32) {
    %c0_i32 = arith.constant 0 : i32
    %c0_i32_0 = arith.constant 0 : i32
    %c0_i32_1 = arith.constant 0 : i32
    return %c0_i32, %c0_i32_0 : i32, i32
  }
  func.func @transform_4(%arg0: i32) -> (i32, i32) {
    %c0_i32 = arith.constant 0 : i32
    %c0_i32_0 = arith.constant 0 : i32
    %c0_i32_1 = arith.constant 0 : i32
    return %c0_i32, %c0_i32_0 : i32, i32
  }
  func.func @transform_5(%arg0: i32) -> (i32, i32) {
    %c0_i32 = arith.constant 0 : i32
    %c0_i32_0 = arith.constant 0 : i32
    %c0_i32_1 = arith.constant 0 : i32
    return %c0_i32, %c0_i32_0 : i32, i32
  }
  func.func @transform_6(%arg0: i32) -> (i32, i32) {
    %c0_i32 = arith.constant 0 : i32
    %c0_i32_0 = arith.constant 0 : i32
    %c0_i32_1 = arith.constant 0 : i32
    return %c0_i32, %c0_i32_0 : i32, i32
  }
  func.func @transform_7(%arg0: i32) -> i32 {
    %c0_i32 = arith.constant 0 : i32
    %c0_i32_0 = arith.constant 0 : i32
    return %c0_i32 : i32
  }
  func.func @transform_8(%arg0: i32) -> (i32, i32, i32) {
    %c0_i32 = arith.constant 0 : i32
    %c0_i32_0 = arith.constant 0 : i32
    %c0_i32_1 = arith.constant 0 : i32
    return %arg0, %c0_i32, %c0_i32_0 : i32, i32, i32
  }
}

</mosaic_0001>

<bundles_post_ra>
// kernel: prediction_module_forward.1
= control target key start
LH: loop header
LB: loop body
LE: loop exit
PB: predicated region body
PF: predicated region fallthrough
CT: control target
= control target key end

     0   :  { %s2203_s29 = smov 0   ;;  %s3429_s0 = inlined_call_operand.vmem [shape: s32[2,256], index: 0, kind: input, shape index: {}]   ;;  %s3430_s1 = inlined_call_operand.vmem [shape: f32[2,36,256], index: 1, kind: input, shape index: {}]   ;;  %s3431_s2 = inlined_call_operand.vmem [shape: f32[256,36], index: 2, kind: input, shape index: {}]   ;;  %s3432_s3 = inlined_call_operand.vmem [shape: f32[256,1], index: 3, kind: input, shape index: {}]   ;;  %s3433_s4 = inlined_call_operand.vmem [shape: f32[256,256], index: 4, kind: input, shape index: {}]   ;;  %s3434_s5 = inlined_call_operand.vmem [shape: f32[256,1], index: 5, kind: input, shape index: {}]   ;;  %s3435_s6 = inlined_call_operand.vmem [shape: f32[9,256], index: 6, kind: input, shape index: {}]   ;;  %s3436_s7 = inlined_call_operand.<no memory space> [shape: f32[1], index: 7, kind: input, shape index: {}]   ;;  %s3437_s8 = inlined_call_operand.vmem [shape: f32[2,1,256], index: 8, kind: output, shape index: {}]  }
   0x1   :  { %13 = sst [smem:[#allocation3]] %s3436_s7 }
   0x2 LB: > { %s2024_s30 = sadd.s32 4294967295, %s2143_s29   ;;  %p2028_p0 = scmp.ge.s32.totalorder %s2143_s29, 1  ;;  %s2143_s29 = sphi %s2203_s29, %s19_s29  }
   0x3   : > { %p263_p1 = scmp.lt.s32.totalorder %s2143_s29, 3 }
   0x5   : > { %p264_p2 = pnand %p2028_p0, %p263_p1 }
   0x7   : > { %267 = sbr.rel (%p264_p2) target bundleno = 1078 (0x436), region = 52 }
   0xc   : > { %v378_v0 = vld [vmem:[%s3432_s3 + $0xf8] sm:$0xff]  ;;  %v377_v1 = vld [vmem:[%s3432_s3 + $0xf0] sm:$0xff]  ;;  %p296_p3 = scmp.lt.s32.totalorder %s2024_s30, 1  ;;  %v2145_v3 = vmov 0   ;;  %vm636_vm0 = vcmask 1043456   ;;  %v360_v4 = vld [vmem:[%s3432_s3 + $0x68] sm:$0xff] }
   0xd   : > { %v362_v2 = vld [vmem:[%s3432_s3 + $0x78] sm:$0xff]  ;;  %2132 = vset.pattern.permute.xlu2 %v2145_v3  ;;  %2131 = vset.pattern.permute.xlu1 %v2145_v3  ;;  %v361_v8 = vld [vmem:[%s3432_s3 + $0x70] sm:$0xff]  ;;  %v359_v9 = vld [vmem:[%s3432_s3 + $0x60] sm:$0xff]  ;;  %vm539_vm1 = vcmask 293888   ;;  %s2147_s25 = smov 17   ;;  %s2148_s26 = smov 15  }
   0xe   : > { %2130 = vset.pattern.permute.xlu0 %v2145_v3  ;;  %536 = vperm.xlu1 %2131, %v378_v0   ;;  %s3580_s30 = smov (!%p296_p3, %s2024_s30), 1  ;;  %v305_v17 = vld [vmem:[%s3431_s2] sm:$0xff]  ;;  %v2244_v19 = vld [vmem:[%s3431_s2 + $0x98] sm:$0xff]  ;;  %v376_v20 = vld [vmem:[%s3432_s3 + $0xe8] sm:$0xff]  ;;  %s2149_s27 = smov 16   ;;  %vm1830_vm11 = vcmask 138240  }
   0xf   : > { %531 = vperm.xlu2 %2132, %v377_v1   ;;  %456 = vperm.xlu0 %2130, %v362_v2   ;;  %s2111_s14 = smul.u32 80, %s3580_s30  ;;  %v325_v18 = vld [vmem:[%s3431_s2 + $0xa0] sm:$0xff]  ;;  %v358_v22 = vld [vmem:[%s3432_s3 + $0x58] sm:$0xff]  ;;  %v306_v23 = vld [vmem:[%s3431_s2 + $0x8] sm:$0xff]  ;;  %s2150_s28 = smov 1   ;;  %vm1845_vm13 = vcmask 130048  }
  0x10   : > { %v375_v21 = vld [vmem:[%s3432_s3 + $0xe0] sm:$0xff]  ;;  %v326_v24 = vld [vmem:[%s3431_s2 + $0xa8] sm:$0xff]  ;;  %v357_v25 = vld [vmem:[%s3432_s3 + $0x50] sm:$0xff]  ;;  %s2151_s9 = smov 113   ;;  %s2152_s10 = smov 127  }
  0x11   : > { %s300_s17 = scalar_lea.vmem %s3430_s1, %s2111_s14  ;;  %v374_v26 = vld [vmem:[%s3432_s3 + $0xd8] sm:$0xff]  ;;  %v356_v27 = vld [vmem:[%s3432_s3 + $0x48] sm:$0xff]  ;;  %v307_v28 = vld [vmem:[%s3431_s2 + $0x10] sm:$0xff]  ;;  %s2153_s7 = smov 112  }
  0x12   : > { %v345_v5 = vld [vmem:[%s300_s17 + $0x40] sm:$0xf]  ;;  %v346_v6 = vld [vmem:[%s300_s17 + $0x48] sm:$0xf]  ;;  %v343_v7 = vld [vmem:[%s300_s17 + $0x30] sm:$0xff]  ;;  %s2154_s11 = smov 111  }
  0x13   : > { %2031 = vmatpush.msk.msra.mxu0 %vm636_vm0, %v345_v5  ;;  %2101 = vmatpush.msk.msra.mxu2 %vm636_vm0, %v345_v5  ;;  %v344_v10 = vld [vmem:[%s300_s17 + $0x38] sm:$0xff]  ;;  %v341_v11 = vld [vmem:[%s300_s17 + $0x20] sm:$0xff]  ;;  %v342_v12 = vld [vmem:[%s300_s17 + $0x28] sm:$0xff]  ;;  %s1944_s16 = sld [smem:[#allocation3]] }
  0x14   : > { %2064 = vmatpush.msk.msra.mxu1 %vm636_vm0, %v346_v6  ;;  %2106 = vmatpush.msk.msra.mxu3 %vm636_vm0, %v346_v6  ;;  %v339_v13 = vld [vmem:[%s300_s17 + $0x10] sm:$0xff]  ;;  %v340_v14 = vld [vmem:[%s300_s17 + $0x18] sm:$0xff]  ;;  %v337_v15 = vld [vmem:[%s300_s17] sm:$0xff] }
  0x15   : > { %655 = vmatpush.msra.mxu0 %v343_v7  ;;  %2102 = vmatpush.msra.mxu2 %v343_v7  ;;  %v338_v16 = vld [vmem:[%s300_s17 + $0x8] sm:$0xff]  ;;  %v327_v29 = vld [vmem:[%s3431_s2 + $0xb0] sm:$0xff]  ;;  %v355_v32 = vld [vmem:[%s3432_s3 + $0x40] sm:$0xff]  ;;  %s2030_s17 = sshll.u32 %s3580_s30, 1 }
  0x16   : > { %446 = vperm.xlu1 %2131, %v360_v4   ;;  %768 = vmatpush.msra.mxu1 %v344_v10  ;;  %v373_v30 = vld [vmem:[%s3432_s3 + $0xd0] sm:$0xff]  ;;  %v372_v31 = vld [vmem:[%s3432_s3 + $0xc8] sm:$0xff]  ;;  %v308_v33 = vld [vmem:[%s3431_s2 + $0x18] sm:$0xff]  ;;  %s304_s20 = scalar_lea.vmem %s3437_s8, %s2030_s17 }
  0x17   : > { %451 = vperm.xlu0 %2130, %v361_v8   ;;  %441 = vperm.xlu2 %2132, %v359_v9   ;;  %v328_v34 = vld [vmem:[%s3431_s2 + $0xb8] sm:$0xff]  ;;  %v371_v36 = vld [vmem:[%s3432_s3 + $0xc0] sm:$0xff]  ;;  %v353_v37 = vld [vmem:[%s3432_s3 + $0x30] sm:$0xff] }
  0x18   : > { %2107 = vmatpush.msra.mxu3 %v344_v10  ;;  %656 = vmatpush.msra.mxu0 %v341_v11  ;;  %v354_v35 = vld [vmem:[%s3432_s3 + $0x38] sm:$0xff]  ;;  %v309_v38 = vld [vmem:[%s3431_s2 + $0x20] sm:$0xff]  ;;  %v369_v41 = vld [vmem:[%s3432_s3 + $0xb0] sm:$0xff] }
  0x19   : > { %2103 = vmatpush.msra.mxu2 %v341_v11  ;;  %769 = vmatpush.msra.mxu1 %v342_v12  ;;  %v329_v39 = vld [vmem:[%s3431_s2 + $0xc0] sm:$0xff]  ;;  %v370_v40 = vld [vmem:[%s3432_s3 + $0xb8] sm:$0xff]  ;;  %v352_v42 = vld [vmem:[%s3432_s3 + $0x28] sm:$0xff] }
  0x1a   : > { %2108 = vmatpush.msra.mxu3 %v342_v12  ;;  %657 = vmatpush.msra.mxu0 %v339_v13  ;;  %v310_v43 = vld [vmem:[%s3431_s2 + $0x28] sm:$0xff]  ;;  %v351_v45 = vld [vmem:[%s3432_s3 + $0x20] sm:$0xff]  ;;  %v350_v47 = vld [vmem:[%s3432_s3 + $0x18] sm:$0xff] }
  0x1b   : > { %2104 = vmatpush.msra.mxu2 %v339_v13  ;;  %770 = vmatpush.msra.mxu1 %v340_v14  ;;  %v330_v44 = vld [vmem:[%s3431_s2 + $0xc8] sm:$0xff]  ;;  %v311_v48 = vld [vmem:[%s3431_s2 + $0x30] sm:$0xff]  ;;  %v367_v50 = vld [vmem:[%s3432_s3 + $0xa0] sm:$0xff] }
  0x1c   : > { %2109 = vmatpush.msra.mxu3 %v340_v14  ;;  %658 = vmatpush.msra.mxu0 %v337_v15  ;;  %v368_v46 = vld [vmem:[%s3432_s3 + $0xa8] sm:$0xff]  ;;  %v331_v49 = vld [vmem:[%s3431_s2 + $0xd0] sm:$0xff]  ;;  %v366_v51 = vld [vmem:[%s3432_s3 + $0x98] sm:$0xff] }
  0x1d   : > { %2105 = vmatpush.msra.mxu2 %v337_v15  ;;  %771 = vmatpush.msra.mxu1 %v338_v16  ;;  %v349_v52 = vld [vmem:[%s3432_s3 + $0x10] sm:$0xff]  ;;  %v312_v53 = vld [vmem:[%s3431_s2 + $0x38] sm:$0xff]  ;;  %v348_v55 = vld [vmem:[%s3432_s3 + $0x8] sm:$0xff] }
  0x1e   : > { %2110 = vmatpush.msra.mxu3 %v338_v16  ;;  %2032 = vmatmul.msk.f32.vlgmr.msra.gmra.mxu0 %vm539_vm1, %v305_v17  ;;  %v332_v54 = vld [vmem:[%s3431_s2 + $0xd8] sm:$0xff]  ;;  %v365_v56 = vld [vmem:[%s3432_s3 + $0x90] sm:$0xff]  ;;  %v347_v57 = vld [vmem:[%s3432_s3] sm:$0xff] }
  0x1f   : > { %2052 = vmatmul.msk.f32.vlgmr.msra.gmra.mxu2 %vm539_vm1, %v325_v18  ;;  %2065 = vmatmul.msk.f32.vlgmr.msra.gmra.mxu1 %vm539_vm1, %v305_v17  ;;  %v313_v58 = vld [vmem:[%s3431_s2 + $0x40] sm:$0xff]  ;;  %v364_v60 = vld [vmem:[%s3432_s3 + $0x88] sm:$0xff]  ;;  %v1012_v62 = vld [vmem:[%s3434_s5 + $0x78] sm:$0xff] }
  0x20   : > { %2084 = vmatmul.msk.f32.vlgmr.msra.gmra.mxu3 %vm539_vm1, %v2244_v19  ;;  %526 = vperm.xlu0 %2130, %v376_v20   ;;  %v333_v59 = vld [vmem:[%s3431_s2 + $0xe0] sm:$0xff]  ;;  %v314_v63 = vld [vmem:[%s3431_s2 + $0x48] sm:$0xff]  ;;  %v1028_v1 = vld [vmem:[%s3434_s5 + $0xf8] sm:$0xff] }
  0x21   : > { %521 = vperm.xlu2 %2132, %v375_v21   ;;  %436 = vperm.xlu1 %2131, %v358_v22   ;;  %v363_v61 = vld [vmem:[%s3432_s3 + $0x80] sm:$0xff]  ;;  %v334_v0 = vld [vmem:[%s3431_s2 + $0xe8] sm:$0xff]  ;;  %v1011_v2 = vld [vmem:[%s3434_s5 + $0x70] sm:$0xff] }
  0x22   : > { %v1027_v3 = vld [vmem:[%s3434_s5 + $0xf0] sm:$0xff]  ;;  %v1010_v6 = vld [vmem:[%s3434_s5 + $0x68] sm:$0xff]  ;;  %v1009_v8 = vld [vmem:[%s3434_s5 + $0x60] sm:$0xff] }
  0x23   : > { %v315_v4 = vld [vmem:[%s3431_s2 + $0x50] sm:$0xff]  ;;  %v1026_v7 = vld [vmem:[%s3434_s5 + $0xe8] sm:$0xff]  ;;  %v316_v9 = vld [vmem:[%s3431_s2 + $0x58] sm:$0xff] }
  0x24   : > { %v335_v5 = vld [vmem:[%s3431_s2 + $0xf0] sm:$0xff]  ;;  %v336_v10 = vld [vmem:[%s3431_s2 + $0xf8] sm:$0xff]  ;;  %v1025_v11 = vld [vmem:[%s3434_s5 + $0xe0] sm:$0xff] }
  0x25   : > { %v1008_v12 = vld [vmem:[%s3434_s5 + $0x58] sm:$0xff]  ;;  %v317_v14 = vld [vmem:[%s3431_s2 + $0x60] sm:$0xff]  ;;  %v1007_v15 = vld [vmem:[%s3434_s5 + $0x50] sm:$0xff] }
  0x26   : > { %2033 = vmatmul.msk.f32.gmra.mxu0 %vm539_vm1, %v306_v23  ;;  %v1024_v13 = vld [vmem:[%s3434_s5 + $0xd8] sm:$0xff]  ;;  %v1023_v16 = vld [vmem:[%s3434_s5 + $0xd0] sm:$0xff]  ;;  %v1006_v17 = vld [vmem:[%s3434_s5 + $0x48] sm:$0xff] }
  0x27   : > { %2053 = vmatmul.msk.f32.gmra.mxu2 %vm539_vm1, %v326_v24  ;;  %2066 = vmatmul.msk.f32.gmra.mxu1 %vm539_vm1, %v306_v23  ;;  %v1022_v20 = vld [vmem:[%s3434_s5 + $0xc8] sm:$0xff]  ;;  %v1005_v21 = vld [vmem:[%s3434_s5 + $0x40] sm:$0xff]  ;;  %v319_v23 = vld [vmem:[%s3431_s2 + $0x70] sm:$0xff] }
  0x28   : > { %2085 = vmatmul.msk.f32.gmra.mxu3 %vm539_vm1, %v325_v18  ;;  %431 = vperm.xlu0 %2130, %v357_v25   ;;  %v318_v18 = vld [vmem:[%s3431_s2 + $0x68] sm:$0xff]  ;;  %v1021_v22 = vld [vmem:[%s3434_s5 + $0xc0] sm:$0xff]  ;;  %v1020_v25 = vld [vmem:[%s3434_s5 + $0xb8] sm:$0xff] }
  0x29   : > { %516 = vperm.xlu1 %2131, %v374_v26   ;;  %426 = vperm.xlu2 %2132, %v356_v27   ;;  %v1003_v26 = vld [vmem:[%s3434_s5 + $0x30] sm:$0xff]  ;;  %v320_v27 = vld [vmem:[%s3431_s2 + $0x78] sm:$0xff] }
  0x2e   : > { %2034 = vmatmul.msk.f32.gmra.mxu0 %vm539_vm1, %v307_v28 }
  0x2f   : > { %2054 = vmatmul.msk.f32.gmra.mxu2 %vm539_vm1, %v327_v29  ;;  %2067 = vmatmul.msk.f32.gmra.mxu1 %vm539_vm1, %v307_v28  ;;  %v1019_v28 = vld [vmem:[%s3434_s5 + $0xb0] sm:$0xff] }
  0x30   : > { %2086 = vmatmul.msk.f32.gmra.mxu3 %vm539_vm1, %v326_v24  ;;  %511 = vperm.xlu0 %2130, %v373_v30   ;;  %v1004_v24 = vld [vmem:[%s3434_s5 + $0x38] sm:$0xff]  ;;  %v1018_v30 = vld [vmem:[%s3434_s5 + $0xa8] sm:$0xff] }
  0x31   : > { %506 = vperm.xlu2 %2132, %v372_v31   ;;  %421 = vperm.xlu1 %2131, %v355_v32   ;;  %v321_v31 = vld [vmem:[%s3431_s2 + $0x80] sm:$0xff] }
  0x36   : > { %2035 = vmatmul.msk.f32.gmra.mxu0 %vm539_vm1, %v308_v33 }
  0x37   : > { %2055 = vmatmul.msk.f32.gmra.mxu2 %vm539_vm1, %v328_v34  ;;  %2068 = vmatmul.msk.f32.gmra.mxu1 %vm539_vm1, %v308_v33 }
  0x38   : > { %2087 = vmatmul.msk.f32.gmra.mxu3 %vm539_vm1, %v327_v29  ;;  %416 = vperm.xlu0 %2130, %v354_v35   ;;  %v1002_v29 = vld [vmem:[%s3434_s5 + $0x28] sm:$0xff]  ;;  %v1017_v35 = vld [vmem:[%s3434_s5 + $0xa0] sm:$0xff] }
  0x39   : > { %501 = vperm.xlu1 %2131, %v371_v36   ;;  %411 = vperm.xlu2 %2132, %v353_v37   ;;  %v1000_v36 = vld [vmem:[%s3434_s5 + $0x18] sm:$0xff] }
  0x3e   : > { %2036 = vmatmul.msk.f32.gmra.mxu0 %vm539_vm1, %v309_v38 }
  0x3f   : > { %2056 = vmatmul.msk.f32.gmra.mxu2 %vm539_vm1, %v329_v39  ;;  %2069 = vmatmul.msk.f32.gmra.mxu1 %vm539_vm1, %v309_v38  ;;  %v322_v38 = vld [vmem:[%s3431_s2 + $0x88] sm:$0xff] }
  0x40   : > { %2088 = vmatmul.msk.f32.gmra.mxu3 %vm539_vm1, %v328_v34  ;;  %496 = vperm.xlu0 %2130, %v370_v40   ;;  %v1001_v34 = vld [vmem:[%s3434_s5 + $0x20] sm:$0xff] }
  0x41   : > { %491 = vperm.xlu2 %2132, %v369_v41   ;;  %406 = vperm.xlu1 %2131, %v352_v42   ;;  %v1016_v42 = vld [vmem:[%s3434_s5 + $0x98] sm:$0xff] }
  0x46   : > { %2037 = vmatmul.msk.f32.gmra.mxu0 %vm539_vm1, %v310_v43 }
  0x47   : > { %2057 = vmatmul.msk.f32.gmra.mxu2 %vm539_vm1, %v330_v44  ;;  %2070 = vmatmul.msk.f32.gmra.mxu1 %vm539_vm1, %v310_v43  ;;  %v999_v43 = vld [vmem:[%s3434_s5 + $0x10] sm:$0xff] }
  0x48   : > { %2089 = vmatmul.msk.f32.gmra.mxu3 %vm539_vm1, %v329_v39  ;;  %401 = vperm.xlu0 %2130, %v351_v45  }
  0x49   : > { %486 = vperm.xlu1 %2131, %v368_v46   ;;  %396 = vperm.xlu2 %2132, %v350_v47   ;;  %v323_v46 = vld [vmem:[%s3431_s2 + $0x90] sm:$0xff] }
  0x4e   : > { %2038 = vmatmul.msk.f32.gmra.mxu0 %vm539_vm1, %v311_v48 }
  0x4f   : > { %2058 = vmatmul.msk.f32.gmra.mxu2 %vm539_vm1, %v331_v49  ;;  %2071 = vmatmul.msk.f32.gmra.mxu1 %vm539_vm1, %v311_v48 }
  0x50   : > { %2090 = vmatmul.msk.f32.gmra.mxu3 %vm539_vm1, %v330_v44  ;;  %481 = vperm.xlu0 %2130, %v367_v50   ;;  %v1015_v44 = vld [vmem:[%s3434_s5 + $0x90] sm:$0xff]  ;;  %v998_v50 = vld [vmem:[%s3434_s5 + $0x8] sm:$0xff] }
  0x51   : > { %476 = vperm.xlu2 %2132, %v366_v51   ;;  %391 = vperm.xlu1 %2131, %v349_v52   ;;  %v1014_v51 = vld [vmem:[%s3434_s5 + $0x88] sm:$0xff]  ;;  %v997_v52 = vld [vmem:[%s3434_s5] sm:$0xff] }
  0x56   : > { %2039 = vmatmul.msk.f32.gmra.mxu0 %vm539_vm1, %v312_v53 }
  0x57   : > { %2059 = vmatmul.msk.f32.gmra.mxu2 %vm539_vm1, %v332_v54  ;;  %2072 = vmatmul.msk.f32.gmra.mxu1 %vm539_vm1, %v312_v53 }
  0x58   : > { %2091 = vmatmul.msk.f32.gmra.mxu3 %vm539_vm1, %v331_v49  ;;  %386 = vperm.xlu0 %2130, %v348_v55  }
  0x59   : > { %471 = vperm.xlu1 %2131, %v365_v56   ;;  %381 = vperm.xlu2 %2132, %v347_v57   ;;  %v1013_v57 = vld [vmem:[%s3434_s5 + $0x80] sm:$0xff] }
  0x5e   : > { %2040 = vmatmul.msk.f32.gmra.mxu0 %vm539_vm1, %v313_v58 }
  0x5f   : > { %2060 = vmatmul.msk.f32.gmra.mxu2 %vm539_vm1, %v333_v59  ;;  %2073 = vmatmul.msk.f32.gmra.mxu1 %vm539_vm1, %v313_v58 }
  0x60   : > { %2092 = vmatmul.msk.f32.gmra.mxu3 %vm539_vm1, %v332_v54  ;;  %466 = vperm.xlu0 %2130, %v364_v60  }
  0x61   : > { %461 = vperm.xlu1 %2131, %v363_v61   ;;  %1106 = vperm.xlu2 %2132, %v1012_v62  }
  0x66   : > { %2041 = vmatmul.msk.f32.gmra.mxu0 %vm539_vm1, %v314_v63 }
  0x67   : > { %2061 = vmatmul.msk.f32.gmra.mxu2 %vm539_vm1, %v334_v0  ;;  %2074 = vmatmul.msk.f32.gmra.mxu1 %vm539_vm1, %v314_v63 }
  0x68   : > { %2093 = vmatmul.msk.f32.gmra.mxu3 %vm539_vm1, %v333_v59  ;;  %1186 = vperm.xlu0 %2130, %v1028_v1  }
  0x69   : > { %1101 = vperm.xlu1 %2131, %v1011_v2   ;;  %1181 = vperm.xlu2 %2132, %v1027_v3  }
  0x6e   : > { %2042 = vmatmul.msk.f32.gmra.mxu0 %vm539_vm1, %v315_v4 }
  0x6f   : > { %2062 = vmatmul.msk.f32.gmra.mxu2 %vm539_vm1, %v335_v5  ;;  %2075 = vmatmul.msk.f32.gmra.mxu1 %vm539_vm1, %v315_v4  ;;  %v532_v4 = vpop.permute.xlu2 %531 }
  0x70   : > { %2094 = vmatmul.msk.f32.gmra.mxu3 %vm539_vm1, %v334_v0  ;;  %1096 = vperm.xlu0 %2130, %v1010_v6  }
  0x71   : > { %1176 = vperm.xlu1 %2131, %v1026_v7   ;;  %1091 = vperm.xlu2 %2132, %v1009_v8  }
  0x76   : > { %2043 = vmatmul.msk.f32.gmra.mxu0 %vm539_vm1, %v316_v9 }
  0x77   : > { %2063 = vmatmul.msk.f32.gmra.mxu2 %vm539_vm1, %v336_v10  ;;  %2076 = vmatmul.msk.f32.gmra.mxu1 %vm539_vm1, %v316_v9 }
  0x78   : > { %2095 = vmatmul.msk.f32.gmra.mxu3 %vm539_vm1, %v335_v5  ;;  %1171 = vperm.xlu0 %2130, %v1025_v11  }
  0x79   : > { %1086 = vperm.xlu1 %2131, %v1008_v12   ;;  %1166 = vperm.xlu2 %2132, %v1024_v13   ;;  %v2633_v12 = vpop.permute.xlu2 %441 }
  0x7e   : > { %2044 = vmatmul.msk.f32.gmra.mxu0 %vm539_vm1, %v317_v14 }
  0x7f   : > { %2077 = vmatmul.msk.f32.gmra.mxu1 %vm539_vm1, %v317_v14 }
  0x80   : > { %2096 = vmatmul.msk.f32.gmra.mxu3 %vm539_vm1, %v336_v10  ;;  %1081 = vperm.xlu0 %2130, %v1007_v15   ;;  %v2617_v2 = vpop.permute.xlu1 %536 }
  0x81   : > { %1161 = vperm.xlu1 %2131, %v1023_v16   ;;  %1076 = vperm.xlu2 %2132, %v1006_v17   ;;  %v2607_v61 = vpop.permute.xlu0 %456 }
  0x86   : > { %2045 = vmatmul.msk.f32.gmra.mxu0 %vm539_vm1, %v318_v18 }
  0x87   : > { %2078 = vmatmul.msk.f32.gmra.mxu1 %vm539_vm1, %v318_v18 }
  0x88   : > { %1156 = vperm.xlu0 %2130, %v1022_v20   ;;  %v2629_v9 = vpop.permute.xlu1 %446 }
  0x89   : > { %1071 = vperm.xlu1 %2131, %v1005_v21   ;;  %1151 = vperm.xlu2 %2132, %v1021_v22   ;;  %v2621_v3 = vpop.permute.xlu0 %451  ;;  %v522_v22 = vpop.permute.xlu2 %521 }
  0x8e   : > { %2046 = vmatmul.msk.f32.gmra.mxu0 %vm539_vm1, %v319_v23 }
  0x8f   : > { %2079 = vmatmul.msk.f32.gmra.mxu1 %vm539_vm1, %v319_v23 }
  0x90   : > { %1066 = vperm.xlu0 %2130, %v1004_v24  }
  0x91   : > { %1146 = vperm.xlu1 %2131, %v1020_v25   ;;  %1061 = vperm.xlu2 %2132, %v1003_v26  }
  0x92   : > { %v2631_v10 = vpop.permute.xlu0 %526 }
  0x93   : > { %v2641_v16 = vpop.permute.xlu1 %436 }
  0x96   : > { %2047 = vmatmul.msk.f32.gmra.mxu0 %vm539_vm1, %v320_v27 }
  0x97   : > { %2080 = vmatmul.msk.f32.gmra.mxu1 %vm539_vm1, %v320_v27 }
  0x98   : > { %1141 = vperm.xlu0 %2130, %v1019_v28  }
  0x99   : > { %1056 = vperm.xlu1 %2131, %v1002_v29   ;;  %1136 = vperm.xlu2 %2132, %v1018_v30   ;;  %v2657_v30 = vpop.permute.xlu2 %426 }
  0x9a   : > { %v2643_v18 = vpop.permute.xlu0 %431 }
  0x9b   : > { %v2529_v32 = vpop.f32.mrf.mxu0  ;;  %v517_v25 = vpop.permute.xlu1 %516 }
  0x9c   : > { %3458 = vst [vmem:[#allocation4_spill] sm:$0xff] %v2529_v32  ;;  %v2531_v33 = vpop.f32.mrf.mxu1 }
  0x9d   : > { %3459 = vst [vmem:[#allocation5_spill] sm:$0xff] %v2531_v33 }
  0x9e   : > { %2048 = vmatmul.msk.f32.gmra.mxu0 %vm539_vm1, %v321_v31 }
  0x9f   : > { %2081 = vmatmul.msk.f32.gmra.mxu1 %vm539_vm1, %v321_v31 }
  0xa0   : > { %1051 = vperm.xlu0 %2130, %v1001_v34  }
  0xa1   : > { %1131 = vperm.xlu1 %2131, %v1017_v35   ;;  %1046 = vperm.xlu2 %2132, %v1000_v36  }
  0xa2   : > { %v2544_v37 = vpop.f32.mrf.mxu2  ;;  %v2653_v28 = vpop.permute.xlu0 %511 }
  0xa3   : > { %v2549_v39 = vpop.f32.mrf.mxu3  ;;  %v2551_v40 = vpop.f32.mrf.mxu0 }
  0xa4   : > { %3460 = vst [vmem:[#allocation6_spill] sm:$0xff] %v2551_v40  ;;  %v2553_v41 = vpop.f32.mrf.mxu1 }
  0xa5   : > { %3461 = vst [vmem:[#allocation7_spill] sm:$0xff] %v2553_v41 }
  0xa6   : > { %2049 = vmatmul.msk.f32.gmra.mxu0 %vm539_vm1, %v322_v38 }
  0xa7   : > { %2082 = vmatmul.msk.f32.gmra.mxu1 %vm539_vm1, %v322_v38  ;;  %v2663_v38 = vpop.permute.xlu1 %421 }
  0xa8   : > { %1126 = vperm.xlu0 %2130, %v1016_v42  }
  0xa9   : > { %1041 = vperm.xlu1 %2131, %v999_v43   ;;  %1121 = vperm.xlu2 %2132, %v1015_v44   ;;  %v2667_v43 = vpop.permute.xlu2 %506 }
  0xaa   : > { %v2566_v45 = vpop.f32.mrf.mxu2  ;;  %v2665_v42 = vpop.permute.xlu0 %416 }
  0xab   : > { %v2571_v47 = vpop.f32.mrf.mxu3  ;;  %v2573_v48 = vpop.f32.mrf.mxu0 }
  0xac   : > { %3462 = vst [vmem:[#allocation8_spill] sm:$0xff] %v2573_v48  ;;  %v2575_v49 = vpop.f32.mrf.mxu1 }
  0xad   : > { %3463 = vst [vmem:[#allocation9_spill] sm:$0xff] %v2575_v49 }
  0xae   : > { %2050 = vmatmul.msk.f32.gmra.mxu0 %vm539_vm1, %v323_v46 }
  0xaf   : > { %2083 = vmatmul.msk.f32.gmra.mxu1 %vm539_vm1, %v323_v46 }
  0xb0   : > { %1036 = vperm.xlu0 %2130, %v998_v50  }
  0xb1   : > { %1116 = vperm.xlu1 %2131, %v1014_v51   ;;  %1031 = vperm.xlu2 %2132, %v997_v52   ;;  %v2673_v52 = vpop.permute.xlu1 %501  ;;  %v2677_v32 = vpop.permute.xlu2 %411 }
  0xb2   : > { %v2588_v53 = vpop.f32.mrf.mxu2  ;;  %3474 = vst [vmem:[#allocation20_spill] sm:$0xff] %v2677_v32 }
  0xb3   : > { %v2590_v54 = vpop.f32.mrf.mxu3  ;;  %v2592_v55 = vpop.f32.mrf.mxu0 }
  0xb4   : > { %3464 = vst [vmem:[#allocation10_spill] sm:$0xff] %v2592_v55  ;;  %v2594_v56 = vpop.f32.mrf.mxu1 }
  0xb5   : > { %3465 = vst [vmem:[#allocation11_spill] sm:$0xff] %v2594_v56 }
  0xb6   : > { %2051 = vmatmul.msk.f32.gmra.mxu0 %vm539_vm1, %v2244_v19 }
  0xb8   : > { %1111 = vperm.xlu0 %2130, %v1013_v57   ;;  %v2675_v57 = vpop.permute.xlu0 %496 }
  0xba   : > { %v2601_v58 = vpop.f32.mrf.mxu2 }
  0xbb   : > { %v2603_v59 = vpop.f32.mrf.mxu3  ;;  %v2605_v60 = vpop.f32.mrf.mxu0 }
  0xbc   : > { %3466 = vst [vmem:[#allocation12_spill] sm:$0xff] %v2605_v60  ;;  %v2609_v62 = vpop.f32.mrf.mxu1 }
  0xbd   : > { %3467 = vst [vmem:[#allocation13_spill] sm:$0xff] %v2609_v62 }
  0xc0   : > { %v2687_v32 = vpop.permute.xlu0 %401 }
  0xc2   : > { %v2611_v63 = vpop.f32.mrf.mxu2 }
  0xc3   : > { %v2613_v0 = vpop.f32.mrf.mxu3  ;;  %v2615_v1 = vpop.f32.mrf.mxu0 }
  0xc4   : > { %3468 = vst [vmem:[#allocation14_spill] sm:$0xff] %v2615_v1  ;;  %v2619_v19 = vpop.f32.mrf.mxu1 }
  0xc5   : > { %3469 = vst [vmem:[#allocation15_spill] sm:$0xff] %v2619_v19 }
  0xca   : > { %v735_v5 = vpop.f32.mrf.mxu2 }
  0xcb   : > { %v2623_v6 = vpop.f32.mrf.mxu3  ;;  %v2625_v7 = vpop.f32.mrf.mxu0 }
  0xcc   : > { %3470 = vst [vmem:[#allocation16_spill] sm:$0xff] %v2625_v7  ;;  %v2627_v8 = vpop.f32.mrf.mxu1  ;;  %v2685_v7 = vpop.permute.xlu1 %406 }
  0xcd   : > { %3471 = vst [vmem:[#allocation17_spill] sm:$0xff] %v2627_v8 }
  0xd2   : > { %v738_v11 = vpop.f32.mrf.mxu2 }
  0xd3   : > { %v2635_v13 = vpop.f32.mrf.mxu3  ;;  %v2637_v14 = vpop.f32.mrf.mxu0 }
  0xd4   : > { %3472 = vst [vmem:[#allocation18_spill] sm:$0xff] %v2637_v14  ;;  %v2639_v15 = vpop.f32.mrf.mxu1 }
  0xd5   : > { %3473 = vst [vmem:[#allocation19_spill] sm:$0xff] %v2639_v15 }
  0xda   : > { %v741_v17 = vpop.f32.mrf.mxu2 }
  0xdb   : > { %v2645_v20 = vpop.f32.mrf.mxu3  ;;  %v2647_v21 = vpop.f32.mrf.mxu0  ;;  %v742_v1 = vadd.f32 %v741_v17, %v517_v25  ;;  %v733_v17 = vadd.f32 %v2611_v63, %v2673_v52 }
  0xdc   : > { %v2649_v23 = vpop.f32.mrf.mxu1 }
  0xdd   : > { %v917_v63 = vmax.f32 %v733_v17, 0.0 }
  0xe2   : > { %v744_v24 = vpop.f32.mrf.mxu2 }
  0xe3   : > { %v854_v26 = vpop.f32.mrf.mxu3  ;;  %v2651_v27 = vpop.f32.mrf.mxu0  ;;  %v745_v60 = vadd.f32 %v744_v24, %v522_v22  ;;  %v730_v24 = vadd.f32 %v2601_v58, %v2675_v57 }
  0xe4   : > { %v2655_v29 = vpop.f32.mrf.mxu1 }
  0xea   : > { %v747_v31 = vpop.f32.mrf.mxu2 }
  0xeb   : > { %v857_v34 = vpop.f32.mrf.mxu3  ;;  %v2659_v35 = vpop.f32.mrf.mxu0  ;;  %v748_v56 = vadd.f32 %v747_v31, %v2631_v10  ;;  %v736_v31 = vadd.f32 %v735_v5, %v2667_v43 }
  0xec   : > { %v2661_v36 = vpop.f32.mrf.mxu1  ;;  %v858_v5 = vadd.f32 %v857_v34, %v522_v22  ;;  %v915_v34 = vmax.f32 %v730_v24, 0.0 }
  0xed   : > { %v927_v8 = vmax.f32 %v748_v56, 0.0  ;;  %v923_v56 = vmax.f32 %v742_v1, 0.0  ;;  %v855_v1 = vadd.f32 %v854_v26, %v517_v25  ;;  %v849_v25 = vadd.f32 %v2635_v13, %v2667_v43 }
  0xee   : > { %v926_v22 = vmax.f32 %v858_v5, 0.0 }
  0xef   : > { %v924_v26 = vmax.f32 %v855_v1, 0.0 }
  0xf2   : > { %v750_v44 = vpop.f32.mrf.mxu2 }
  0xf3   : > { %v860_v46 = vpop.f32.mrf.mxu3  ;;  %v2669_v50 = vpop.f32.mrf.mxu0  ;;  %v751_v41 = vadd.f32 %v750_v44, %v532_v4  ;;  %v925_v44 = vmax.f32 %v745_v60, 0.0 }
  0xf4   : > { %v2671_v51 = vpop.f32.mrf.mxu1 }
  0xf5   : > { %v929_v19 = vmax.f32 %v751_v41, 0.0 }
  0xfa   : > { %v753_v33 = vpop.f32.mrf.mxu2 }
  0xfb   : > { %v754_v40 = vadd.f32 %v753_v33, %v2617_v2  ;;  %v863_v49 = vpop.f32.mrf.mxu3  ;;  %v2680_v48 = vpop.f32.mrf.mxu0  ;;  %v739_v33 = vadd.f32 %v738_v11, %v2653_v28  ;;  %v861_v11 = vadd.f32 %v860_v46, %v2631_v10 }
  0xfc   : > { %v2683_v55 = vpop.f32.mrf.mxu1 }
  0xfd   : > { %v931_v62 = vmax.f32 %v754_v40, 0.0  ;;  %v864_v40 = vadd.f32 %v863_v49, %v532_v4 }
  0xff   : > { %1302 = vmatpush.msrb.mxu3 %v931_v62  ;;  %v930_v49 = vmax.f32 %v864_v40, 0.0 }
 0x101   : > { %1303 = vmatpush.msrb.mxu3 %v929_v19  ;;  %v492_v19 = vpop.permute.xlu2 %491 }
 0x102   : > { %v727_v4 = vadd.f32 %v2588_v53, %v492_v19  ;;  %v840_v17 = vadd.f32 %v2603_v59, %v492_v19 }
 0x103   : > { %1304 = vmatpush.msrb.mxu3 %v927_v8  ;;  %v866_v15 = vpop.f32.mrf.mxu3  ;;  %v2690_v14 = vpop.f32.mrf.mxu0  ;;  %v921_v8 = vmax.f32 %v739_v33, 0.0  ;;  %v852_v33 = vadd.f32 %v2645_v20, %v2653_v28 }
 0x104   : > { %v867_v62 = vadd.f32 %v866_v15, %v2617_v2  ;;  %v2694_v41 = vpop.f32.mrf.mxu1  ;;  %v919_v2 = vmax.f32 %v736_v31, 0.0  ;;  %v928_v15 = vmax.f32 %v861_v11, 0.0  ;;  %v482_v31 = vpop.permute.xlu0 %481  ;;  %v913_v40 = vmax.f32 %v727_v4, 0.0 }
 0x105   : > { %1305 = vmatpush.msrb.mxu3 %v925_v44  ;;  %v487_v44 = vpop.permute.xlu1 %486  ;;  %v721_v53 = vadd.f32 %v2544_v37, %v482_v31  ;;  %v922_v20 = vmax.f32 %v852_v33, 0.0  ;;  %v920_v37 = vmax.f32 %v849_v25, 0.0  ;;  %v813_v19 = vadd.f32 %v2694_v41, %v2629_v9 }
 0x106   : > { %v932_v60 = vmax.f32 %v867_v62, 0.0  ;;  %v724_v46 = vadd.f32 %v2566_v45, %v487_v44  ;;  %v846_v45 = vadd.f32 %v2623_v6, %v2673_v52  ;;  %v697_v4 = vadd.f32 %v2680_v48, %v2633_v12 }
 0x107   : > { %1306 = vmatpush.msrb.mxu3 %v923_v56  ;;  %v843_v56 = vadd.f32 %v2613_v0, %v2675_v57  ;;  %v909_v13 = vmax.f32 %v721_v53, 0.0  ;;  %v837_v0 = vadd.f32 %v2590_v54, %v487_v44  ;;  %v700_v57 = vadd.f32 %v2690_v14, %v2629_v9  ;;  %v3475_v53 = vld [vmem:[#allocation18_spill] sm:$0xff] }
 0x108   : > { %1528 = vmatpush.msrb.mxu1 %v932_v60  ;;  %v911_v28 = vmax.f32 %v724_v46, 0.0  ;;  %v918_v52 = vmax.f32 %v846_v45, 0.0  ;;  %v810_v14 = vadd.f32 %v2683_v55, %v2633_v12  ;;  %v896_v55 = vmax.f32 %v813_v19, 0.0  ;;  %v3484_v19 = vld [vmem:[#allocation10_spill] sm:$0xff] }
 0x109   : > { %1307 = vmatpush.msrb.mxu3 %v921_v8  ;;  %v2708_v62 = vpop.permute.xlu2 %396  ;;  %v916_v5 = vmax.f32 %v843_v56, 0.0  ;;  %v912_v48 = vmax.f32 %v837_v0, 0.0  ;;  %v691_v12 = vadd.f32 %v2659_v35, %v2643_v18  ;;  %v804_v46 = vadd.f32 %v2661_v36, %v2643_v18 }
 0x10a   : > { %1529 = vmatpush.msrb.mxu1 %v930_v49  ;;  %v894_v33 = vmax.f32 %v810_v14, 0.0  ;;  %v801_v35 = vadd.f32 %v2655_v29, %v2657_v30  ;;  %v798_v36 = vadd.f32 %v2649_v23, %v2663_v38  ;;  %v682_v25 = vadd.f32 %v3475_v53, %v2665_v42  ;;  %v3476_v29 = vld [vmem:[#allocation19_spill] sm:$0xff]  ;;  %v3486_v14 = vld [vmem:[#allocation8_spill] sm:$0xff] }
 0x10b   : > { %1308 = vmatpush.msrb.mxu3 %v919_v2  ;;  %v702_v10 = vpop.f32.mrf.mxu0  ;;  %v834_v2 = vadd.f32 %v2571_v47, %v482_v31  ;;  %v694_v47 = vadd.f32 %v2669_v50, %v2641_v16  ;;  %v893_v50 = vmax.f32 %v697_v4, 0.0  ;;  %v889_v18 = vmax.f32 %v691_v12, 0.0  ;;  %v3485_v4 = vld [vmem:[#allocation11_spill] sm:$0xff] }
 0x10c   : > { %1530 = vmatpush.msrb.mxu1 %v928_v15  ;;  %v815_v58 = vpop.f32.mrf.mxu1  ;;  %v703_v11 = vadd.f32 %v702_v10, %v2621_v3  ;;  %v895_v15 = vmax.f32 %v700_v57, 0.0  ;;  %v387_v31 = vpop.permute.xlu0 %386  ;;  %v3483_v57 = vld [vmem:[#allocation13_spill] sm:$0xff] }
 0x10d   : > { %1309 = vmatpush.msrb.mxu3 %v917_v63  ;;  %v816_v8 = vadd.f32 %v815_v58, %v2621_v3  ;;  %v2733_v41 = vpop.permute.xlu1 %391  ;;  %v807_v63 = vadd.f32 %v2671_v51, %v2641_v16  ;;  %v910_v10 = vmax.f32 %v834_v2, 0.0  ;;  %v688_v16 = vadd.f32 %v2651_v27, %v2657_v30 }
 0x10e   : > { %1531 = vmatpush.msrb.mxu1 %v926_v22  ;;  %v897_v3 = vmax.f32 %v703_v11, 0.0  ;;  %v891_v58 = vmax.f32 %v694_v47, 0.0  ;;  %v890_v27 = vmax.f32 %v804_v46, 0.0  ;;  %v795_v30 = vadd.f32 %v3476_v29, %v2665_v42 }
 0x10f   : > { %1310 = vmatpush.msrb.mxu3 %v915_v34  ;;  %v898_v1 = vmax.f32 %v816_v8, 0.0  ;;  %v892_v22 = vmax.f32 %v807_v63, 0.0  ;;  %v685_v34 = vadd.f32 %v2647_v21, %v2663_v38  ;;  %v888_v21 = vmax.f32 %v801_v35, 0.0  ;;  %v3482_v8 = vld [vmem:[#allocation12_spill] sm:$0xff] }
 0x110   : > { %1532 = vmatpush.msrb.mxu1 %v924_v26  ;;  %v887_v26 = vmax.f32 %v688_v16, 0.0  ;;  %v883_v11 = vmax.f32 %v682_v25, 0.0  ;;  %v3489_v16 = vld [vmem:[#allocation7_spill] sm:$0xff] }
 0x111   : > { %1311 = vmatpush.msrb.mxu3 %v913_v40  ;;  %v2727_v54 = vpop.permute.xlu2 %476  ;;  %v885_v56 = vmax.f32 %v685_v34, 0.0  ;;  %v3490_v34 = vld [vmem:[#allocation4_spill] sm:$0xff] }
 0x112   : > { %1533 = vmatpush.msrb.mxu1 %v922_v20  ;;  %v831_v9 = vadd.f32 %v2549_v39, %v2727_v54  ;;  %v3477_v20 = vld [vmem:[#allocation20_spill] sm:$0xff] }
 0x113   : > { %1312 = vmatpush.msrb.mxu3 %v911_v28  ;;  %v705_v43 = vpop.f32.mrf.mxu0  ;;  %v3478_v28 = vld [vmem:[#allocation16_spill] sm:$0xff] }
 0x114   : > { %1534 = vmatpush.msrb.mxu1 %v920_v37  ;;  %v706_v60 = vadd.f32 %v705_v43, %v2607_v61  ;;  %v818_v6 = vpop.f32.mrf.mxu1  ;;  %v908_v51 = vmax.f32 %v831_v9, 0.0  ;;  %v679_v23 = vadd.f32 %v3478_v28, %v3477_v20  ;;  %v3479_v37 = vld [vmem:[#allocation17_spill] sm:$0xff]  ;;  %v886_v43 = vmax.f32 %v798_v36, 0.0  ;;  %v467_v9 = vpop.permute.xlu0 %466 }
 0x115   : > { %1313 = vmatpush.msrb.mxu3 %v909_v13  ;;  %v819_v24 = vadd.f32 %v818_v6, %v2607_v61  ;;  %v914_v61 = vmax.f32 %v840_v17, 0.0  ;;  %v2761_v45 = vpop.permute.xlu1 %471  ;;  %v792_v13 = vadd.f32 %v3479_v37, %v3477_v20  ;;  %v3480_v17 = vld [vmem:[#allocation14_spill] sm:$0xff]  ;;  %v3491_v36 = vld [vmem:[#allocation5_spill] sm:$0xff] }
 0x116   : > { %1535 = vmatpush.msrb.mxu1 %v918_v52  ;;  %v899_v59 = vmax.f32 %v706_v60, 0.0  ;;  %v676_v42 = vadd.f32 %v3480_v17, %v2685_v7  ;;  %v3481_v60 = vld [vmem:[#allocation15_spill] sm:$0xff]  ;;  %v884_v52 = vmax.f32 %v795_v30, 0.0  ;;  %v881_v0 = vmax.f32 %v679_v23, 0.0  ;;  %v934_v30 = vld [vmem:[%s3433_s4 + $0x8] sm:$0xff]  ;;  %v933_v23 = vld [vmem:[%s3433_s4] sm:$0xff] }
 0x117   : > { %v900_v49 = vmax.f32 %v819_v24, 0.0  ;;  %v789_v6 = vadd.f32 %v3481_v60, %v2685_v7  ;;  %v673_v24 = vadd.f32 %v3482_v8, %v2687_v32  ;;  %v783_v7 = vadd.f32 %v3485_v4, %v2708_v62  ;;  %v939_v60 = vld [vmem:[%s3433_s4 + $0x30] sm:$0xff]  ;;  %v944_v8 = vld [vmem:[%s3433_s4 + $0x58] sm:$0xff] }
 0x118   : > { %1536 = vmatpush.msrb.mxu1 %v916_v5  ;;  %1189 = vmatpush.msrb.mxu2 %v899_v59  ;;  %v786_v5 = vadd.f32 %v3483_v57, %v2687_v32  ;;  %v882_v59 = vmax.f32 %v792_v13, 0.0  ;;  %v879_v2 = vmax.f32 %v676_v42, 0.0  ;;  %v937_v42 = vld [vmem:[%s3433_s4 + $0x20] sm:$0xff]  ;;  %v946_v57 = vld [vmem:[%s3433_s4 + $0x68] sm:$0xff] }
 0x119   : > { %1415 = vmatpush.msrb.mxu0 %v900_v49  ;;  %v670_v49 = vadd.f32 %v3484_v19, %v2708_v62  ;;  %v877_v32 = vmax.f32 %v673_v24, 0.0  ;;  %v3488_v62 = vld [vmem:[#allocation6_spill] sm:$0xff]  ;;  %v876_v35 = vmax.f32 %v783_v7, 0.0  ;;  %v948_v19 = vld [vmem:[%s3433_s4 + $0x78] sm:$0xff]  ;;  %v950_v7 = vld [vmem:[%s3433_s4 + $0x88] sm:$0xff] }
 0x11a   : > { %1537 = vmatpush.msrb.mxu1 %v914_v61  ;;  %1190 = vmatpush.msrb.mxu2 %v897_v3  ;;  %v880_v3 = vmax.f32 %v789_v6, 0.0  ;;  %v942_v6 = vld [vmem:[%s3433_s4 + $0x48] sm:$0xff] }
 0x11b   : > { %1416 = vmatpush.msrb.mxu0 %v898_v1  ;;  %v2739_v44 = vpop.f32.mrf.mxu0  ;;  %v667_v1 = vadd.f32 %v3486_v14, %v2733_v41 }
 0x11c   : > { %1538 = vmatpush.msrb.mxu1 %v912_v48  ;;  %v2743_v39 = vpop.f32.mrf.mxu1  ;;  %1191 = vmatpush.msrb.mxu2 %v895_v15  ;;  %v382_v48 = vpop.permute.xlu2 %381  ;;  %v3487_v15 = vld [vmem:[#allocation9_spill] sm:$0xff] }
 0x11d   : > { %1417 = vmatpush.msrb.mxu0 %v896_v55  ;;  %v780_v63 = vadd.f32 %v3487_v15, %v2733_v41  ;;  %v462_v46 = vpop.permute.xlu1 %461  ;;  %v873_v41 = vmax.f32 %v667_v1, 0.0  ;;  %v952_v1 = vld [vmem:[%s3433_s4 + $0x98] sm:$0xff] }
 0x11e   : > { %1539 = vmatpush.msrb.mxu1 %v910_v10  ;;  %1192 = vmatpush.msrb.mxu2 %v893_v50  ;;  %v878_v10 = vmax.f32 %v786_v5, 0.0  ;;  %v664_v50 = vadd.f32 %v3488_v62, %v387_v31  ;;  %v945_v5 = vld [vmem:[%s3433_s4 + $0x60] sm:$0xff]  ;;  %v955_v62 = vld [vmem:[%s3433_s4 + $0xb0] sm:$0xff] }
 0x11f   : > { %1418 = vmatpush.msrb.mxu0 %v894_v33  ;;  %v875_v33 = vmax.f32 %v670_v49, 0.0  ;;  %v874_v53 = vmax.f32 %v780_v63, 0.0  ;;  %v947_v49 = vld [vmem:[%s3433_s4 + $0x70] sm:$0xff]  ;;  %v953_v63 = vld [vmem:[%s3433_s4 + $0xa0] sm:$0xff] }
 0x120   : > { %1540 = vmatpush.msrb.mxu1 %v908_v51  ;;  %1193 = vmatpush.msrb.mxu2 %v891_v58  ;;  %v777_v51 = vadd.f32 %v3489_v16, %v387_v31  ;;  %v822_v58 = vadd.f32 %v2743_v39, %v462_v46  ;;  %v957_v16 = vld [vmem:[%s3433_s4 + $0xc0] sm:$0xff] }
 0x121   : > { %1419 = vmatpush.msrb.mxu0 %v892_v22 }
 0x122   : > { %1194 = vmatpush.msrb.mxu2 %v889_v18  ;;  %v661_v18 = vadd.f32 %v3490_v34, %v382_v48  ;;  %v872_v29 = vmax.f32 %v777_v51, 0.0  ;;  %v902_v39 = vmax.f32 %v822_v58, 0.0 }
 0x123   : > { %1420 = vmatpush.msrb.mxu0 %v890_v27  ;;  %v2759_v40 = vpop.f32.mrf.mxu0  ;;  %v774_v27 = vadd.f32 %v3491_v36, %v382_v48  ;;  %v954_v48 = vld [vmem:[%s3433_s4 + $0xa8] sm:$0xff] }
 0x124   : > { %v824_v38 = vpop.f32.mrf.mxu1  ;;  %1195 = vmatpush.msrb.mxu2 %v887_v26  ;;  %v871_v26 = vmax.f32 %v664_v50, 0.0  ;;  %v869_v28 = vmax.f32 %v661_v18, 0.0  ;;  %v2826_v24 = vpop.permute.xlu2 %1106  ;;  %v962_v36 = vld [vmem:[%s3433_s4 + $0xe8] sm:$0xff] }
 0x125   : > { %1421 = vmatpush.msrb.mxu0 %v888_v21  ;;  %v825_v55 = vadd.f32 %v824_v38, %v467_v9  ;;  %v870_v38 = vmax.f32 %v774_v27, 0.0  ;;  %v961_v27 = vld [vmem:[%s3433_s4 + $0xe0] sm:$0xff] }
 0x126   : > { %1196 = vmatpush.msrb.mxu2 %v885_v56  ;;  %v712_v56 = vadd.f32 %v2759_v40, %v467_v9  ;;  %v935_v40 = vld [vmem:[%s3433_s4 + $0x10] sm:$0xff] }
 0x127   : > { %1422 = vmatpush.msrb.mxu0 %v886_v43  ;;  %v904_v25 = vmax.f32 %v825_v55, 0.0  ;;  %v936_v43 = vld [vmem:[%s3433_s4 + $0x18] sm:$0xff]  ;;  %v951_v9 = vld [vmem:[%s3433_s4 + $0x90] sm:$0xff] }
 0x128   : > { %1197 = vmatpush.msrb.mxu2 %v883_v11  ;;  %v903_v13 = vmax.f32 %v712_v56, 0.0  ;;  %v940_v11 = vld [vmem:[%s3433_s4 + $0x38] sm:$0xff] }
 0x129   : > { %1423 = vmatpush.msrb.mxu0 %v884_v52  ;;  %v941_v52 = vld [vmem:[%s3433_s4 + $0x40] sm:$0xff] }
 0x12a   : > { %1198 = vmatpush.msrb.mxu2 %v881_v0  ;;  %v943_v0 = vld [vmem:[%s3433_s4 + $0x50] sm:$0xff] }
 0x12b   : > { %1424 = vmatpush.msrb.mxu0 %v882_v59  ;;  %v714_v61 = vpop.f32.mrf.mxu0 }
 0x12c   : > { %v827_v47 = vpop.f32.mrf.mxu1  ;;  %1199 = vmatpush.msrb.mxu2 %v879_v2  ;;  %v715_v21 = vadd.f32 %v714_v61, %v2761_v45  ;;  %v2837_v59 = vpop.permute.xlu2 %1181  ;;  %v949_v61 = vld [vmem:[%s3433_s4 + $0x80] sm:$0xff] }
 0x12d   : > { %v828_v12 = vadd.f32 %v827_v47, %v2761_v45  ;;  %1425 = vmatpush.msrb.mxu0 %v880_v3  ;;  %v709_v45 = vadd.f32 %v2739_v44, %v462_v46  ;;  %v938_v44 = vld [vmem:[%s3433_s4 + $0x28] sm:$0xff]  ;;  %3492 = vst [vmem:[#allocation18_spill] sm:$0xff] %v2837_v59  ;;  %v2845_v2 = vpop.permute.xlu0 %1186  ;;  %v2865_v47 = vpop.permute.xlu1 %1101 }
 0x12e   : > { %1200 = vmatpush.msrb.mxu2 %v877_v32  ;;  %3493 = vst [vmem:[#allocation19_spill] sm:$0xff] %v2845_v2  ;;  %v958_v46 = vld [vmem:[%s3433_s4 + $0xc8] sm:$0xff]  ;;  %v987_v2 = vld [vmem:[%s3433_s4 + $0x1b0] sm:$0xff] }
 0x12f   : > { %1426 = vmatpush.msrb.mxu0 %v878_v10  ;;  %v906_v22 = vmax.f32 %v828_v12, 0.0  ;;  %v901_v17 = vmax.f32 %v709_v45, 0.0  ;;  %v956_v12 = vld [vmem:[%s3433_s4 + $0xb8] sm:$0xff] }
 0x130   : > { %1201 = vmatpush.msrb.mxu2 %v875_v33  ;;  %v968_v45 = vld [vmem:[%s3433_s4 + $0x118] sm:$0xff] }
 0x131   : > { %1427 = vmatpush.msrb.mxu0 %v876_v35  ;;  %1541 = vmatpush.msrb.mxu1 %v906_v22  ;;  %v960_v35 = vld [vmem:[%s3433_s4 + $0xd8] sm:$0xff]  ;;  %v959_v22 = vld [vmem:[%s3433_s4 + $0xd0] sm:$0xff] }
 0x132   : > { %1202 = vmatpush.msrb.mxu2 %v873_v41 }
 0x133   : > { %1428 = vmatpush.msrb.mxu0 %v874_v53  ;;  %1542 = vmatpush.msrb.mxu1 %v904_v25  ;;  %v717_v31 = vpop.f32.mrf.mxu0 }
 0x134   : > { %v718_v20 = vadd.f32 %v717_v31, %v2727_v54  ;;  %1203 = vmatpush.msrb.mxu2 %v871_v26  ;;  %v905_v54 = vmax.f32 %v715_v21, 0.0  ;;  %v2847_v4 = vpop.permute.xlu2 %1091  ;;  %v964_v26 = vld [vmem:[%s3433_s4 + $0xf8] sm:$0xff]  ;;  %v966_v21 = vld [vmem:[%s3433_s4 + $0x108] sm:$0xff] }
 0x135   : > { %1429 = vmatpush.msrb.mxu0 %v872_v29  ;;  %1543 = vmatpush.msrb.mxu1 %v902_v39  ;;  %v2855_v3 = vpop.permute.xlu0 %1096  ;;  %v2877_v55 = vpop.permute.xlu1 %1176  ;;  %v963_v29 = vld [vmem:[%s3433_s4 + $0xf0] sm:$0xff] }
 0x136   : > { %1204 = vmatpush.msrb.mxu2 %v869_v28  ;;  %v907_v37 = vmax.f32 %v718_v20, 0.0  ;;  %1544 = vmatmul.f32.vlgmr.msrb.gmra.mxu1 %v934_v30  ;;  %3496 = vst [vmem:[#allocation17_spill] sm:$0xff] %v2877_v55  ;;  %v965_v28 = vld [vmem:[%s3433_s4 + $0x100] sm:$0xff]  ;;  %v988_v55 = vld [vmem:[%s3433_s4 + $0x1b8] sm:$0xff] }
 0x137   : > { %1430 = vmatpush.msrb.mxu0 %v870_v38  ;;  %1205 = vmatmul.f32.vlgmr.msrb.gmra.mxu2 %v933_v23 }
 0x138   : > { %1431 = vmatmul.f32.vlgmr.msrb.gmra.mxu0 %v933_v23  ;;  %1314 = vmatpush.msrb.mxu3 %v907_v37 }
 0x13a   : > { %1315 = vmatpush.msrb.mxu3 %v905_v54 }
 0x13c   : > { %1316 = vmatpush.msrb.mxu3 %v903_v13  ;;  %v2857_v14 = vpop.permute.xlu2 %1166  ;;  %v967_v13 = vld [vmem:[%s3433_s4 + $0x110] sm:$0xff] }
 0x13d   : > { %3494 = vst [vmem:[#allocation20_spill] sm:$0xff] %v2857_v14  ;;  %v2867_v32 = vpop.permute.xlu0 %1171  ;;  %v2892_v33 = vpop.permute.xlu1 %1086  ;;  %v984_v14 = vld [vmem:[%s3433_s4 + $0x198] sm:$0xff] }
 0x13e   : > { %1317 = vmatpush.msrb.mxu3 %v901_v17  ;;  %1547 = vmatmul.f32.gmra.mxu1 %v936_v43  ;;  %3495 = vst [vmem:[#allocation16_spill] sm:$0xff] %v2867_v32 }
 0x13f   : > { %1208 = vmatmul.f32.gmra.mxu2 %v935_v40  ;;  %1318 = vmatmul.f32.vlgmr.msrb.gmra.mxu3 %v934_v30 }
 0x140   : > { %1434 = vmatmul.f32.gmra.mxu0 %v935_v40 }
 0x144   : > { %v2872_v15 = vpop.permute.xlu2 %1076 }
 0x145   : > { %v2882_v10 = vpop.permute.xlu0 %1081  ;;  %v2907_v34 = vpop.permute.xlu1 %1161 }
 0x146   : > { %1550 = vmatmul.f32.gmra.mxu1 %v938_v44  ;;  %3500 = vst [vmem:[#allocation13_spill] sm:$0xff] %v2907_v34 }
 0x147   : > { %1211 = vmatmul.f32.gmra.mxu2 %v937_v42  ;;  %1321 = vmatmul.f32.gmra.mxu3 %v936_v43 }
 0x148   : > { %1437 = vmatmul.f32.gmra.mxu0 %v937_v42 }
 0x14c   : > { %v2887_v50 = vpop.permute.xlu2 %1151 }
 0x14d   : > { %3497 = vst [vmem:[#allocation14_spill] sm:$0xff] %v2887_v50  ;;  %v2897_v51 = vpop.permute.xlu0 %1156  ;;  %v2919_v53 = vpop.permute.xlu1 %1071 }
 0x14e   : > { %1553 = vmatmul.f32.gmra.mxu1 %v940_v11  ;;  %3498 = vst [vmem:[#allocation15_spill] sm:$0xff] %v2897_v51 }
 0x14f   : > { %1214 = vmatmul.f32.gmra.mxu2 %v939_v60  ;;  %1324 = vmatmul.f32.gmra.mxu3 %v938_v44 }
 0x150   : > { %1440 = vmatmul.f32.gmra.mxu0 %v939_v60 }
 0x154   : > { %v2899_v58 = vpop.permute.xlu2 %1061 }
 0x155   : > { %3499 = vst [vmem:[#allocation12_spill] sm:$0xff] %v2899_v58  ;;  %v2909_v18 = vpop.permute.xlu0 %1066  ;;  %v2931_v39 = vpop.permute.xlu1 %1146 }
 0x156   : > { %1556 = vmatmul.f32.gmra.mxu1 %v942_v6  ;;  %3501 = vst [vmem:[#allocation10_spill] sm:$0xff] %v2909_v18 }
 0x157   : > { %1217 = vmatmul.f32.gmra.mxu2 %v941_v52  ;;  %1327 = vmatmul.f32.gmra.mxu3 %v940_v11  ;;  %3504 = vst [vmem:[#allocation9_spill] sm:$0xff] %v2931_v39  ;;  %v994_v39 = vld [vmem:[%s3433_s4 + $0x1e8] sm:$0xff] }
 0x158   : > { %1443 = vmatmul.f32.gmra.mxu0 %v941_v52  ;;  %v970_v52 = vld [vmem:[%s3433_s4 + $0x128] sm:$0xff] }
 0x15c   : > { %v2911_v41 = vpop.permute.xlu2 %1136 }
 0x15d   : > { %v2921_v25 = vpop.permute.xlu0 %1141  ;;  %v2952_v54 = vpop.permute.xlu1 %1056 }
 0x15e   : > { %1559 = vmatmul.f32.gmra.mxu1 %v944_v8  ;;  %3502 = vst [vmem:[#allocation11_spill] sm:$0xff] %v2921_v25 }
 0x15f   : > { %1220 = vmatmul.f32.gmra.mxu2 %v943_v0  ;;  %1330 = vmatmul.f32.gmra.mxu3 %v942_v6  ;;  %3509 = vst [vmem:[#allocation21_spill] sm:$0xff] %v2952_v54 }
 0x160   : > { %1446 = vmatmul.f32.gmra.mxu0 %v943_v0 }
 0x164   : > { %v2926_v31 = vpop.permute.xlu2 %1046 }
 0x165   : > { %3503 = vst [vmem:[#allocation8_spill] sm:$0xff] %v2926_v31  ;;  %v2938_v20 = vpop.permute.xlu0 %1051 }
 0x166   : > { %1562 = vmatmul.f32.gmra.mxu1 %v946_v57  ;;  %3506 = vst [vmem:[#allocation7_spill] sm:$0xff] %v2938_v20 }
 0x167   : > { %1223 = vmatmul.f32.gmra.mxu2 %v945_v5  ;;  %1333 = vmatmul.f32.gmra.mxu3 %v944_v8  ;;  %v969_v8 = vld [vmem:[%s3433_s4 + $0x120] sm:$0xff] }
 0x168   : > { %1449 = vmatmul.f32.gmra.mxu0 %v945_v5 }
 0x16c   : > { %v2945_v38 = vpop.permute.xlu2 %1121 }
 0x16d   : > { %v2959_v17 = vpop.permute.xlu0 %1126 }
 0x16e   : > { %1565 = vmatmul.f32.gmra.mxu1 %v948_v19 }
 0x16f   : > { %1226 = vmatmul.f32.gmra.mxu2 %v947_v49  ;;  %1336 = vmatmul.f32.gmra.mxu3 %v946_v57  ;;  %v2976_v57 = vpop.permute.xlu1 %1131 }
 0x170   : > { %1452 = vmatmul.f32.gmra.mxu0 %v947_v49 }
 0x174   : > { %v2961_v40 = vpop.permute.xlu2 %1031 }
 0x175   : > { %3511 = vst [vmem:[#allocation23_spill] sm:$0xff] %v2961_v40  ;;  %v2978_v5 = vpop.permute.xlu0 %1036 }
 0x176   : > { %1568 = vmatmul.f32.gmra.mxu1 %v950_v7  ;;  %3514 = vst [vmem:[#allocation26_spill] sm:$0xff] %v2978_v5 }
 0x177   : > { %1229 = vmatmul.f32.gmra.mxu2 %v949_v61  ;;  %1339 = vmatmul.f32.gmra.mxu3 %v948_v19 }
 0x178   : > { %1455 = vmatmul.f32.gmra.mxu0 %v949_v61 }
 0x17e   : > { %1571 = vmatmul.f32.gmra.mxu1 %v952_v1 }
 0x17f   : > { %1232 = vmatmul.f32.gmra.mxu2 %v951_v9  ;;  %1342 = vmatmul.f32.gmra.mxu3 %v950_v7 }
 0x180   : > { %1458 = vmatmul.f32.gmra.mxu0 %v951_v9  ;;  %v972_v9 = vld [vmem:[%s3433_s4 + $0x138] sm:$0xff] }
 0x186   : > { %1574 = vmatmul.f32.gmra.mxu1 %v954_v48 }
 0x187   : > { %1235 = vmatmul.f32.gmra.mxu2 %v953_v63  ;;  %1345 = vmatmul.f32.gmra.mxu3 %v952_v1 }
 0x188   : > { %1461 = vmatmul.f32.gmra.mxu0 %v953_v63 }
 0x18e   : > { %1577 = vmatmul.f32.gmra.mxu1 %v956_v12 }
 0x18f   : > { %1238 = vmatmul.f32.gmra.mxu2 %v955_v62  ;;  %1348 = vmatmul.f32.gmra.mxu3 %v954_v48  ;;  %v971_v48 = vld [vmem:[%s3433_s4 + $0x130] sm:$0xff] }
 0x190   : > { %1464 = vmatmul.f32.gmra.mxu0 %v955_v62 }
 0x196   : > { %1580 = vmatmul.f32.gmra.mxu1 %v958_v46 }
 0x197   : > { %1241 = vmatmul.f32.gmra.mxu2 %v957_v16  ;;  %1351 = vmatmul.f32.gmra.mxu3 %v956_v12  ;;  %v2993_v12 = vpop.permute.xlu1 %1041 }
 0x198   : > { %1467 = vmatmul.f32.gmra.mxu0 %v957_v16  ;;  %3517 = vst [vmem:[#allocation29_spill] sm:$0xff] %v2993_v12 }
 0x19e   : > { %1583 = vmatmul.f32.gmra.mxu1 %v960_v35 }
 0x19f   : > { %1244 = vmatmul.f32.gmra.mxu2 %v959_v22  ;;  %1354 = vmatmul.f32.gmra.mxu3 %v958_v46 }
 0x1a0   : > { %1470 = vmatmul.f32.gmra.mxu0 %v959_v22 }
 0x1a6   : > { %1586 = vmatmul.f32.gmra.mxu1 %v962_v36 }
 0x1a7   : > { %1247 = vmatmul.f32.gmra.mxu2 %v961_v27  ;;  %1357 = vmatmul.f32.gmra.mxu3 %v960_v35 }
 0x1a8   : > { %1473 = vmatmul.f32.gmra.mxu0 %v961_v27  ;;  %v973_v27 = vld [vmem:[%s3433_s4 + $0x140] sm:$0xff] }
 0x1ae   : > { %1589 = vmatmul.f32.gmra.mxu1 %v964_v26 }
 0x1af   : > { %1250 = vmatmul.f32.gmra.mxu2 %v963_v29  ;;  %1360 = vmatmul.f32.gmra.mxu3 %v962_v36  ;;  %v974_v36 = vld [vmem:[%s3433_s4 + $0x148] sm:$0xff] }
 0x1b0   : > { %1476 = vmatmul.f32.gmra.mxu0 %v963_v29 }
 0x1b3   : > { %v2933_v30 = vpop.f32.mrf.mxu1 }
 0x1b4   : > { %3505 = vst [vmem:[#allocation6_spill] sm:$0xff] %v2933_v30  ;;  %v990_v30 = vld [vmem:[%s3433_s4 + $0x1c8] sm:$0xff] }
 0x1b5   : > { %v2943_v23 = vpop.f32.mrf.mxu0 }
 0x1b6   : > { %3507 = vst [vmem:[#allocation4_spill] sm:$0xff] %v2943_v23  ;;  %1592 = vmatmul.f32.gmra.mxu1 %v966_v21 }
 0x1b7   : > { %1253 = vmatmul.f32.gmra.mxu2 %v965_v28  ;;  %1363 = vmatmul.f32.gmra.mxu3 %v964_v26 }
 0x1b8   : > { %1479 = vmatmul.f32.gmra.mxu0 %v965_v28 }
 0x1ba   : > { %v1206_v56 = vpop.f32.mrf.mxu2 }
 0x1bb   : > { %v2947_v37 = vpop.f32.mrf.mxu1  ;;  %v1207_v44 = vadd.f32 %v1206_v56, %v2961_v40  ;;  %v992_v40 = vld [vmem:[%s3433_s4 + $0x1d8] sm:$0xff] }
 0x1bc   : > { %3508 = vst [vmem:[#allocation5_spill] sm:$0xff] %v2947_v37  ;;  %v989_v37 = vld [vmem:[%s3433_s4 + $0x1c0] sm:$0xff] }
 0x1bd   : > { %v2957_v43 = vpop.f32.mrf.mxu0 }
 0x1be   : > { %3510 = vst [vmem:[#allocation22_spill] sm:$0xff] %v2957_v43  ;;  %1595 = vmatmul.f32.gmra.mxu1 %v968_v45 }
 0x1bf   : > { %1256 = vmatmul.f32.gmra.mxu2 %v967_v13  ;;  %1366 = vmatmul.f32.gmra.mxu3 %v966_v21 }
 0x1c0   : > { %1482 = vmatmul.f32.gmra.mxu0 %v967_v13  ;;  %v976_v13 = vld [vmem:[%s3433_s4 + $0x158] sm:$0xff] }
 0x1c2   : > { %v1209_v42 = vpop.f32.mrf.mxu2  ;;  %v1319_v11 = vpop.f32.mrf.mxu3 }
 0x1c3   : > { %v2964_v60 = vadd.f32 %v1319_v11, %v1207_v44  ;;  %v2966_v6 = vpop.f32.mrf.mxu1  ;;  %v1210_v19 = vadd.f32 %v1209_v42, %v2978_v5  ;;  %v975_v44 = vld [vmem:[%s3433_s4 + $0x150] sm:$0xff] }
 0x1c4   : > { %3512 = vst [vmem:[#allocation24_spill] sm:$0xff] %v2966_v6 }
 0x1c5   : > { %v2974_v0 = vpop.f32.mrf.mxu0 }
 0x1c6   : > { %3513 = vst [vmem:[#allocation25_spill] sm:$0xff] %v2974_v0  ;;  %1598 = vmatmul.f32.gmra.mxu1 %v970_v52 }
 0x1c7   : > { %1259 = vmatmul.f32.gmra.mxu2 %v969_v8  ;;  %1369 = vmatmul.f32.gmra.mxu3 %v968_v45 }
 0x1c8   : > { %1485 = vmatmul.f32.gmra.mxu0 %v969_v8 }
 0x1ca   : > { %v1212_v49 = vpop.f32.mrf.mxu2  ;;  %v1322_v7 = vpop.f32.mrf.mxu3 }
 0x1cb   : > { %v2981_v61 = vadd.f32 %v1322_v7, %v1210_v19  ;;  %v2983_v1 = vpop.f32.mrf.mxu1  ;;  %v1213_v62 = vadd.f32 %v1212_v49, %v2993_v12  ;;  %v978_v7 = vld [vmem:[%s3433_s4 + $0x168] sm:$0xff] }
 0x1cc   : > { %3515 = vst [vmem:[#allocation27_spill] sm:$0xff] %v2983_v1  ;;  %v991_v1 = vld [vmem:[%s3433_s4 + $0x1d0] sm:$0xff] }
 0x1cd   : > { %v2991_v63 = vpop.f32.mrf.mxu0 }
 0x1ce   : > { %3516 = vst [vmem:[#allocation28_spill] sm:$0xff] %v2991_v63  ;;  %1601 = vmatmul.f32.gmra.mxu1 %v972_v9  ;;  %v995_v63 = vld [vmem:[%s3433_s4 + $0x1f0] sm:$0xff] }
 0x1cf   : > { %1262 = vmatmul.f32.gmra.mxu2 %v971_v48  ;;  %1372 = vmatmul.f32.gmra.mxu3 %v970_v52 }
 0x1d0   : > { %1488 = vmatmul.f32.gmra.mxu0 %v971_v48 }
 0x1d2   : > { %v1215_v46 = vpop.f32.mrf.mxu2  ;;  %v1325_v16 = vpop.f32.mrf.mxu3 }
 0x1d3   : > { %v2996_v35 = vadd.f32 %v1325_v16, %v1213_v62  ;;  %v2998_v22 = vpop.f32.mrf.mxu1  ;;  %v1216_v29 = vadd.f32 %v1215_v46, %v2926_v31 }
 0x1d4   : > { %3518 = vst [vmem:[#allocation30_spill] sm:$0xff] %v2998_v22  ;;  %v993_v22 = vld [vmem:[%s3433_s4 + $0x1e0] sm:$0xff] }
 0x1d5   : > { %v3006_v26 = vpop.f32.mrf.mxu0 }
 0x1d6   : > { %3519 = vst [vmem:[#allocation31_spill] sm:$0xff] %v3006_v26  ;;  %1604 = vmatmul.f32.gmra.mxu1 %v974_v36 }
 0x1d7   : > { %1265 = vmatmul.f32.gmra.mxu2 %v973_v27  ;;  %1375 = vmatmul.f32.gmra.mxu3 %v972_v9  ;;  %v977_v9 = vld [vmem:[%s3433_s4 + $0x160] sm:$0xff] }
 0x1d8   : > { %1491 = vmatmul.f32.gmra.mxu0 %v973_v27 }
 0x1da   : > { %v1218_v21 = vpop.f32.mrf.mxu2  ;;  %v1328_v28 = vpop.f32.mrf.mxu3 }
 0x1db   : > { %v3009_v56 = vadd.f32 %v1328_v28, %v1216_v29  ;;  %v3011_v45 = vpop.f32.mrf.mxu1  ;;  %v1219_v11 = vadd.f32 %v1218_v21, %v2938_v20  ;;  %v980_v29 = vld [vmem:[%s3433_s4 + $0x178] sm:$0xff]  ;;  %v979_v21 = vld [vmem:[%s3433_s4 + $0x170] sm:$0xff] }
 0x1dc   : > { %3520 = vst [vmem:[#allocation32_spill] sm:$0xff] %v3011_v45  ;;  %v996_v45 = vld [vmem:[%s3433_s4 + $0x1f8] sm:$0xff] }
 0x1dd   : > { %v3019_v42 = vpop.f32.mrf.mxu0 }
 0x1de   : > { %3521 = vst [vmem:[#allocation33_spill] sm:$0xff] %v3019_v42  ;;  %1607 = vmatmul.f32.gmra.mxu1 %v976_v13 }
 0x1df   : > { %1268 = vmatmul.f32.gmra.mxu2 %v975_v44  ;;  %1378 = vmatmul.f32.gmra.mxu3 %v974_v36 }
 0x1e0   : > { %1494 = vmatmul.f32.gmra.mxu0 %v975_v44 }
 0x1e2   : > { %v1221_v52 = vpop.f32.mrf.mxu2  ;;  %v1331_v8 = vpop.f32.mrf.mxu3 }
 0x1e3   : > { %v3022_v19 = vadd.f32 %v1331_v8, %v1219_v11  ;;  %v3024_v49 = vpop.f32.mrf.mxu1  ;;  %v1222_v62 = vadd.f32 %v1221_v52, %v2952_v54 }
 0x1e4   : > { %3522 = vst [vmem:[#allocation34_spill] sm:$0xff] %v3024_v49  ;;  %v1112_v49 = vpop.permute.xlu0 %1111 }
 0x1e5   : > { %v3032_v48 = vpop.f32.mrf.mxu0 }
 0x1e6   : > { %3523 = vst [vmem:[#allocation35_spill] sm:$0xff] %v3032_v48  ;;  %1610 = vmatmul.f32.gmra.mxu1 %v978_v7 }
 0x1e7   : > { %1271 = vmatmul.f32.gmra.mxu2 %v977_v9  ;;  %1381 = vmatmul.f32.gmra.mxu3 %v976_v13 }
 0x1e8   : > { %1497 = vmatmul.f32.gmra.mxu0 %v977_v9  ;;  %v982_v9 = vld [vmem:[%s3433_s4 + $0x188] sm:$0xff] }
 0x1ea   : > { %v1224_v46 = vpop.f32.mrf.mxu2  ;;  %v1334_v16 = vpop.f32.mrf.mxu3 }
 0x1eb   : > { %v3035_v36 = vadd.f32 %v1334_v16, %v1222_v62  ;;  %v3037_v27 = vpop.f32.mrf.mxu1  ;;  %v1225_v13 = vadd.f32 %v1224_v46, %v2899_v58  ;;  %v981_v62 = vld [vmem:[%s3433_s4 + $0x180] sm:$0xff] }
 0x1ec   : > { %3524 = vst [vmem:[#allocation36_spill] sm:$0xff] %v3037_v27 }
 0x1ed   : > { %v3045_v28 = vpop.f32.mrf.mxu0 }
 0x1ee   : > { %3525 = vst [vmem:[#allocation37_spill] sm:$0xff] %v3045_v28  ;;  %1613 = vmatmul.f32.gmra.mxu1 %v980_v29  ;;  %v1117_v28 = vpop.permute.xlu1 %1116 }
 0x1ef   : > { %1274 = vmatmul.f32.gmra.mxu2 %v979_v21  ;;  %1384 = vmatmul.f32.gmra.mxu3 %v978_v7 }
 0x1f0   : > { %1500 = vmatmul.f32.gmra.mxu0 %v979_v21 }
 0x1f2   : > { %v1227_v44 = vpop.f32.mrf.mxu2  ;;  %v1337_v11 = vpop.f32.mrf.mxu3 }
 0x1f3   : > { %v3048_v52 = vadd.f32 %v1337_v11, %v1225_v13  ;;  %v1569_v8 = vpop.f32.mrf.mxu1  ;;  %v1228_v46 = vadd.f32 %v1227_v44, %v2909_v18 }
 0x1f5   : > { %v1456_v16 = vpop.f32.mrf.mxu0 }
 0x1f6   : > { %v1457_v51 = vadd.f32 %v1456_v16, %v2919_v53  ;;  %1616 = vmatmul.f32.gmra.mxu1 %v982_v9  ;;  %v986_v16 = vld [vmem:[%s3433_s4 + $0x1a8] sm:$0xff] }
 0x1f7   : > { %1277 = vmatmul.f32.gmra.mxu2 %v981_v62  ;;  %1387 = vmatmul.f32.gmra.mxu3 %v980_v29  ;;  %v983_v29 = vld [vmem:[%s3433_s4 + $0x190] sm:$0xff] }
 0x1f8   : > { %v3057_v7 = vadd.f32 %v1569_v8, %v1457_v51  ;;  %1503 = vmatmul.f32.gmra.mxu0 %v981_v62 }
 0x1fa   : > { %3526 = vst [vmem:[#allocation38_spill] sm:$0xff] %v3057_v7  ;;  %v3060_v21 = vpop.f32.mrf.mxu2  ;;  %v1340_v13 = vpop.f32.mrf.mxu3 }
 0x1fb   : > { %v3062_v11 = vadd.f32 %v1340_v13, %v1228_v46  ;;  %v3064_v34 = vpop.f32.mrf.mxu1  ;;  %v985_v46 = vld [vmem:[%s3433_s4 + $0x1a0] sm:$0xff] }
 0x1fc   : > { %3527 = vst [vmem:[#allocation39_spill] sm:$0xff] %v3064_v34 }
 0x1fd   : > { %v3072_v51 = vpop.f32.mrf.mxu0 }
 0x1fe   : > { %1619 = vmatmul.f32.gmra.mxu1 %v984_v14 }
 0x1ff   : > { %1280 = vmatmul.f32.gmra.mxu2 %v983_v29  ;;  %1390 = vmatmul.f32.gmra.mxu3 %v982_v9 }
 0x200   : > { %1506 = vmatmul.f32.gmra.mxu0 %v983_v29 }
 0x202   : > { %v3074_v44 = vpop.f32.mrf.mxu2  ;;  %v3076_v8 = vpop.f32.mrf.mxu3 }
 0x203   : > { %v3078_v62 = vpop.f32.mrf.mxu1 }
 0x204   : > { %3528 = vst [vmem:[#allocation40_spill] sm:$0xff] %v3078_v62 }
 0x205   : > { %v3086_v13 = vpop.f32.mrf.mxu0 }
 0x206   : > { %1622 = vmatmul.f32.gmra.mxu1 %v986_v16 }
 0x207   : > { %1283 = vmatmul.f32.gmra.mxu2 %v985_v46  ;;  %1393 = vmatmul.f32.gmra.mxu3 %v984_v14 }
 0x208   : > { %1509 = vmatmul.f32.gmra.mxu0 %v985_v46 }
 0x20a   : > { %v3088_v9 = vpop.f32.mrf.mxu2  ;;  %v3090_v29 = vpop.f32.mrf.mxu3 }
 0x20b   : > { %v3092_v32 = vpop.f32.mrf.mxu1 }
 0x20c   : > { %3529 = vst [vmem:[#allocation41_spill] sm:$0xff] %v3092_v32 }
 0x20d   : > { %v3100_v59 = vpop.f32.mrf.mxu0 }
 0x20e   : > { %1625 = vmatmul.f32.gmra.mxu1 %v988_v55 }
 0x20f   : > { %1286 = vmatmul.f32.gmra.mxu2 %v987_v2  ;;  %1396 = vmatmul.f32.gmra.mxu3 %v986_v16 }
 0x210   : > { %1512 = vmatmul.f32.gmra.mxu0 %v987_v2 }
 0x212   : > { %v1239_v14 = vpop.f32.mrf.mxu2  ;;  %v3102_v46 = vpop.f32.mrf.mxu3 }
 0x213   : > { %v3104_v50 = vpop.f32.mrf.mxu1 }
 0x215   : > { %v3112_v6 = vpop.f32.mrf.mxu0 }
 0x216   : > { %1628 = vmatmul.f32.gmra.mxu1 %v990_v30 }
 0x217   : > { %1289 = vmatmul.f32.gmra.mxu2 %v989_v37  ;;  %1399 = vmatmul.f32.gmra.mxu3 %v988_v55 }
 0x218   : > { %1515 = vmatmul.f32.gmra.mxu0 %v989_v37 }
 0x21a   : > { %v1242_v2 = vpop.f32.mrf.mxu2  ;;  %v1352_v16 = vpop.f32.mrf.mxu3 }
 0x21b   : > { %v3114_v23 = vpop.f32.mrf.mxu1  ;;  %v1243_v18 = vadd.f32 %v1242_v2, %v2847_v4 }
 0x21d   : > { %v3122_v43 = vpop.f32.mrf.mxu0 }
 0x21e   : > { %1631 = vmatmul.f32.gmra.mxu1 %v992_v40 }
 0x21f   : > { %1292 = vmatmul.f32.gmra.mxu2 %v991_v1  ;;  %1402 = vmatmul.f32.gmra.mxu3 %v990_v30 }
 0x220   : > { %1518 = vmatmul.f32.gmra.mxu0 %v991_v1 }
 0x222   : > { %v1245_v55 = vpop.f32.mrf.mxu2  ;;  %v1355_v37 = vpop.f32.mrf.mxu3 }
 0x223   : > { %v3124_v5 = vpop.f32.mrf.mxu1  ;;  %v1246_v58 = vadd.f32 %v1245_v55, %v2855_v3  ;;  %v1237_v55 = vadd.f32 %v3088_v9, %v2882_v10 }
 0x225   : > { %v3132_v0 = vpop.f32.mrf.mxu0 }
 0x226   : > { %1634 = vmatmul.f32.gmra.mxu1 %v994_v39 }
 0x227   : > { %1295 = vmatmul.f32.gmra.mxu2 %v993_v22  ;;  %1405 = vmatmul.f32.gmra.mxu3 %v992_v40 }
 0x228   : > { %1521 = vmatmul.f32.gmra.mxu0 %v993_v22 }
 0x22a   : > { %v1248_v30 = vpop.f32.mrf.mxu2  ;;  %v1358_v1 = vpop.f32.mrf.mxu3 }
 0x22b   : > { %v3134_v12 = vpop.f32.mrf.mxu1  ;;  %v1249_v42 = vadd.f32 %v1248_v30, %v2865_v47  ;;  %v1359_v62 = vadd.f32 %v1358_v1, %v1246_v58  ;;  %v1234_v58 = vadd.f32 %v3074_v44, %v2872_v15  ;;  %v1350_v1 = vadd.f32 %v3102_v46, %v1237_v55 }
 0x22d   : > { %v3142_v31 = vpop.f32.mrf.mxu0  ;;  %v1347_v9 = vadd.f32 %v3090_v29, %v1234_v58  ;;  %v1661_v44 = vmax.f32 %v1350_v1, 0.0  ;;  %v1655_v29 = vmax.f32 %v3062_v11, 0.0  ;;  %v1645_v1 = vmax.f32 %v2996_v35, 0.0 }
 0x22e   : > { %1637 = vmatmul.f32.gmra.mxu1 %v996_v45 }
 0x22f   : > { %1298 = vmatmul.f32.gmra.mxu2 %v995_v63  ;;  %1408 = vmatmul.f32.gmra.mxu3 %v994_v39 }
 0x230   : > { %1524 = vmatmul.f32.gmra.mxu0 %v995_v63 }
 0x232   : > { %v1251_v40 = vpop.f32.mrf.mxu2  ;;  %v1361_v22 = vpop.f32.mrf.mxu3 }
 0x233   : > { %v1593_v7 = vpop.f32.mrf.mxu1  ;;  %v1252_v54 = vadd.f32 %v1251_v40, %v2826_v24  ;;  %v1362_v34 = vadd.f32 %v1361_v22, %v1249_v42 }
 0x235   : > { %v1480_v26 = vpop.f32.mrf.mxu0  ;;  %v1669_v30 = vmax.f32 %v1362_v34, 0.0  ;;  %v1231_v34 = vadd.f32 %v3060_v21, %v2919_v53 }
 0x236   : > { %v1481_v20 = vadd.f32 %v1480_v26, %v1112_v49 }
 0x237   : > { %1411 = vmatmul.f32.gmra.mxu3 %v996_v45 }
 0x238   : > { %v3144_v27 = vadd.f32 %v1593_v7, %v1481_v20  ;;  %v1240_v20 = vadd.f32 %v1239_v14, %v2892_v33  ;;  %v1356_v7 = vadd.f32 %v1355_v37, %v1243_v18  ;;  %v1659_v37 = vmax.f32 %v1347_v9, 0.0 }
 0x23a   : > { %v1254_v25 = vpop.f32.mrf.mxu2  ;;  %v1364_v48 = vpop.f32.mrf.mxu3  ;;  %v1353_v42 = vadd.f32 %v1352_v16, %v1240_v20  ;;  %v1665_v14 = vmax.f32 %v1356_v7, 0.0  ;;  %v1344_v16 = vadd.f32 %v3076_v8, %v1231_v34  ;;  %v1653_v7 = vmax.f32 %v3048_v52, 0.0 }
 0x23b   : > { %v1365_v39 = vadd.f32 %v1364_v48, %v1252_v54  ;;  %v1596_v63 = vpop.f32.mrf.mxu1  ;;  %v1667_v54 = vmax.f32 %v1359_v62, 0.0  ;;  %v1255_v48 = vadd.f32 %v1254_v25, %v1112_v49  ;;  %v1647_v52 = vmax.f32 %v3009_v56, 0.0 }
 0x23c   : > { %v1663_v62 = vmax.f32 %v1353_v42, 0.0  ;;  %v1641_v34 = vmax.f32 %v2964_v60, 0.0 }
 0x23d   : > { %v1671_v32 = vmax.f32 %v1365_v39, 0.0  ;;  %v1483_v26 = vpop.f32.mrf.mxu0 }
 0x23e   : > { %v1484_v45 = vadd.f32 %v1483_v26, %v1117_v28 }
 0x23f   : > { %1709 = vmatpush.msra.mxu2 %v1671_v32 }
 0x240   : > { %v3151_v40 = vadd.f32 %v1596_v63, %v1484_v45  ;;  %v1657_v45 = vmax.f32 %v1344_v16, 0.0  ;;  %v3531_v16 = vld [vmem:[#allocation40_spill] sm:$0xff] }
 0x241   : > { %1710 = vmatpush.msra.mxu2 %v1669_v30 }
 0x242   : > { %v1257_v22 = vpop.f32.mrf.mxu2  ;;  %v1367_v2 = vpop.f32.mrf.mxu3 }
 0x243   : > { %v3158_v18 = vadd.f32 %v1367_v2, %v1255_v48  ;;  %1711 = vmatpush.msra.mxu2 %v1667_v54  ;;  %v1599_v32 = vpop.f32.mrf.mxu1  ;;  %v1258_v39 = vadd.f32 %v1257_v22, %v1117_v28  ;;  %v1651_v28 = vmax.f32 %v3035_v36, 0.0  ;;  %v1649_v48 = vmax.f32 %v3022_v19, 0.0 }
 0x244   : > { %v1478_v2 = vadd.f32 %v3142_v31, %v2826_v24  ;;  %v1475_v36 = vadd.f32 %v3132_v0, %v2865_v47  ;;  %v1472_v19 = vadd.f32 %v3122_v43, %v2855_v3  ;;  %v1643_v24 = vmax.f32 %v2981_v61, 0.0 }
 0x245   : > { %v1486_v25 = vpop.f32.mrf.mxu0  ;;  %1712 = vmatpush.msra.mxu2 %v1665_v14  ;;  %v1469_v47 = vadd.f32 %v3112_v6, %v2847_v4  ;;  %v1466_v43 = vadd.f32 %v3100_v59, %v2892_v33  ;;  %v1463_v4 = vadd.f32 %v3086_v13, %v2882_v10 }
 0x246   : > { %v1487_v49 = vadd.f32 %v1486_v25, %v2945_v38  ;;  %v1591_v14 = vadd.f32 %v3134_v12, %v1478_v2  ;;  %v1588_v0 = vadd.f32 %v3124_v5, %v1475_v36  ;;  %v1585_v61 = vadd.f32 %v3114_v23, %v1472_v19  ;;  %v3530_v25 = vld [vmem:[#allocation41_spill] sm:$0xff] }
 0x247   : > { %1713 = vmatpush.msra.mxu2 %v1663_v62  ;;  %v1582_v6 = vadd.f32 %v3104_v50, %v1469_v47  ;;  %v1460_v62 = vadd.f32 %v3072_v51, %v2872_v15  ;;  %v3534_v51 = vld [vmem:[#allocation39_spill] sm:$0xff] }
 0x248   : > { %v3165_v46 = vadd.f32 %v1599_v32, %v1487_v49  ;;  %v1670_v5 = vmax.f32 %v1588_v0, 0.0  ;;  %v1579_v49 = vadd.f32 %v3530_v25, %v1466_v43  ;;  %v1668_v59 = vmax.f32 %v1585_v61, 0.0  ;;  %v3546_v43 = vld [vmem:[#allocation28_spill] sm:$0xff] }
 0x249   : > { %1714 = vmatpush.msra.mxu2 %v1661_v44  ;;  %v1576_v44 = vadd.f32 %v3531_v16, %v1463_v4  ;;  %v1666_v10 = vmax.f32 %v1582_v6, 0.0  ;;  %v3548_v6 = vld [vmem:[#allocation29_spill] sm:$0xff]  ;;  %v3552_v16 = vld [vmem:[#allocation26_spill] sm:$0xff] }
 0x24a   : > { %v1260_v63 = vpop.f32.mrf.mxu2  ;;  %v1370_v26 = vpop.f32.mrf.mxu3 }
 0x24b   : > { %v3167_v53 = vadd.f32 %v1370_v26, %v1258_v39  ;;  %1715 = vmatpush.msra.mxu2 %v1659_v37  ;;  %v1602_v21 = vpop.f32.mrf.mxu1  ;;  %v1261_v55 = vadd.f32 %v1260_v63, %v2945_v38  ;;  %v3532_v63 = vld [vmem:[#allocation10_spill] sm:$0xff]  ;;  %v3533_v26 = vld [vmem:[#allocation37_spill] sm:$0xff] }
 0x24c   : > { %v1454_v15 = vadd.f32 %v3533_v26, %v3532_v63 }
 0x24d   : > { %v1489_v20 = vpop.f32.mrf.mxu0  ;;  %1716 = vmatpush.msra.mxu2 %v1657_v45  ;;  %v1573_v45 = vadd.f32 %v3534_v51, %v1460_v62  ;;  %v3550_v62 = vld [vmem:[#allocation30_spill] sm:$0xff]  ;;  %v3556_v51 = vld [vmem:[#allocation4_spill] sm:$0xff] }
 0x24e   : > { %v1490_v8 = vadd.f32 %v1489_v20, %v2959_v17  ;;  %v3535_v20 = vld [vmem:[#allocation12_spill] sm:$0xff] }
 0x24f   : > { %1717 = vmatpush.msra.mxu2 %v1655_v29 }
 0x250   : > { %v3172_v30 = vadd.f32 %v1602_v21, %v1490_v8  ;;  %v1664_v21 = vmax.f32 %v1579_v49, 0.0  ;;  %v3536_v8 = vld [vmem:[#allocation35_spill] sm:$0xff] }
 0x251   : > { %1718 = vmatpush.msra.mxu2 %v1653_v7  ;;  %v1662_v7 = vmax.f32 %v1576_v44, 0.0  ;;  %v3553_v44 = vld [vmem:[#allocation22_spill] sm:$0xff] }
 0x252   : > { %v1263_v42 = vpop.f32.mrf.mxu2  ;;  %v1373_v54 = vpop.f32.mrf.mxu3 }
 0x253   : > { %v3177_v22 = vadd.f32 %v1373_v54, %v1261_v55  ;;  %1719 = vmatpush.msra.mxu2 %v1651_v28  ;;  %v1605_v11 = vpop.f32.mrf.mxu1  ;;  %v1264_v31 = vadd.f32 %v1263_v42, %v2959_v17  ;;  %v1672_v17 = vmax.f32 %v1591_v14, 0.0  ;;  %v3537_v28 = vld [vmem:[#allocation11_spill] sm:$0xff]  ;;  %v3538_v42 = vld [vmem:[#allocation21_spill] sm:$0xff]  ;;  %v3543_v14 = vld [vmem:[#allocation34_spill] sm:$0xff] }
 0x254   : > { %v3539_v54 = vld [vmem:[#allocation33_spill] sm:$0xff] }
 0x255   : > { %v1492_v58 = vpop.f32.mrf.mxu0  ;;  %1720 = vmatpush.msra.mxu2 %v1649_v48  ;;  %v1448_v48 = vadd.f32 %v3539_v54, %v3538_v42 }
 0x256   : > { %v1493_v38 = vadd.f32 %v1492_v58, %v2976_v57 }
 0x257   : > { %1721 = vmatpush.msra.mxu2 %v1647_v52  ;;  %v1660_v52 = vmax.f32 %v1573_v45, 0.0 }
 0x258   : > { %v3189_v32 = vadd.f32 %v1605_v11, %v1493_v38  ;;  %v3540_v11 = vld [vmem:[#allocation36_spill] sm:$0xff]  ;;  %v3541_v38 = vld [vmem:[#allocation7_spill] sm:$0xff] }
 0x259   : > { %1722 = vmatpush.msra.mxu2 %v1645_v1  ;;  %v1567_v2 = vadd.f32 %v3540_v11, %v1454_v15  ;;  %v3542_v1 = vld [vmem:[#allocation31_spill] sm:$0xff] }
 0x25a   : > { %v1266_v56 = vpop.f32.mrf.mxu2  ;;  %v1376_v35 = vpop.f32.mrf.mxu3  ;;  %v1445_v19 = vadd.f32 %v3542_v1, %v3541_v38  ;;  %v3555_v15 = vld [vmem:[#allocation23_spill] sm:$0xff] }
 0x25b   : > { %v3197_v9 = vadd.f32 %v1376_v35, %v1264_v31  ;;  %1723 = vmatpush.msra.mxu2 %v1643_v24  ;;  %v1608_v3 = vpop.f32.mrf.mxu1  ;;  %v1267_v23 = vadd.f32 %v1266_v56, %v2976_v57  ;;  %v1451_v57 = vadd.f32 %v3536_v8, %v3535_v20  ;;  %v3544_v31 = vld [vmem:[#allocation38_spill] sm:$0xff]  ;;  %v1656_v4 = vmax.f32 %v1567_v2, 0.0 }
 0x25c   : > { %v1658_v47 = vmax.f32 %v3544_v31, 0.0  ;;  %v1558_v25 = vadd.f32 %v3550_v62, %v1445_v19  ;;  %v1433_v45 = vadd.f32 %v3556_v51, %v3555_v15  ;;  %v3559_v2 = vld [vmem:[#allocation6_spill] sm:$0xff] }
 0x25d   : > { %v1495_v12 = vpop.f32.mrf.mxu0  ;;  %1724 = vmatpush.msra.mxu2 %v1641_v34  ;;  %v1564_v24 = vadd.f32 %v3543_v14, %v1451_v57  ;;  %v3561_v15 = vld [vmem:[#allocation18_spill] sm:$0xff] }
 0x25e   : > { %v1496_v60 = vadd.f32 %v1495_v12, %v2911_v41  ;;  %v1650_v20 = vmax.f32 %v1558_v25, 0.0 }
 0x25f   : > { %1755 = vmatpush.msrb.mxu2 %v1672_v17  ;;  %v3547_v17 = vld [vmem:[#allocation32_spill] sm:$0xff]  ;;  %v1654_v49 = vmax.f32 %v1564_v24, 0.0 }
 0x260   : > { %v3209_v33 = vadd.f32 %v1608_v3, %v1496_v60  ;;  %v3545_v3 = vld [vmem:[#allocation8_spill] sm:$0xff]  ;;  %v1561_v12 = vadd.f32 %v3547_v17, %v1448_v48 }
 0x261   : > { %1756 = vmatpush.msrb.mxu2 %v1670_v5  ;;  %v1442_v61 = vadd.f32 %v3546_v43, %v3545_v3  ;;  %v3549_v5 = vld [vmem:[#allocation25_spill] sm:$0xff] }
 0x262   : > { %v1269_v13 = vpop.f32.mrf.mxu2  ;;  %v1379_v50 = vpop.f32.mrf.mxu3  ;;  %v1439_v60 = vadd.f32 %v3549_v5, %v3548_v6 }
 0x263   : > { %1757 = vmatpush.msrb.mxu2 %v1668_v59  ;;  %v3213_v37 = vadd.f32 %v1379_v50, %v1267_v23  ;;  %v1611_v39 = vpop.f32.mrf.mxu1  ;;  %v1270_v36 = vadd.f32 %v1269_v13, %v2911_v41  ;;  %v3551_v59 = vld [vmem:[#allocation9_spill] sm:$0xff]  ;;  %v3554_v13 = vld [vmem:[#allocation27_spill] sm:$0xff] }
 0x264   : > { %v1555_v50 = vadd.f32 %v3554_v13, %v1442_v61 }
 0x265   : > { %1758 = vmatpush.msrb.mxu2 %v1666_v10  ;;  %v1498_v29 = vpop.f32.mrf.mxu0  ;;  %v1436_v10 = vadd.f32 %v3553_v44, %v3552_v16 }
 0x266   : > { %v1499_v55 = vadd.f32 %v1498_v29, %v3537_v28  ;;  %v1648_v54 = vmax.f32 %v1555_v50, 0.0 }
 0x267   : > { %1759 = vmatpush.msrb.mxu2 %v1664_v21  ;;  %v3557_v21 = vld [vmem:[#allocation24_spill] sm:$0xff] }
 0x268   : > { %v3224_v58 = vadd.f32 %v1611_v39, %v1499_v55  ;;  %v1652_v39 = vmax.f32 %v1561_v12, 0.0  ;;  %v1552_v29 = vadd.f32 %v3557_v21, %v1439_v60  ;;  %v3558_v55 = vld [vmem:[#allocation5_spill] sm:$0xff] }
 0x269   : > { %1760 = vmatpush.msrb.mxu2 %v1662_v7  ;;  %v1549_v42 = vadd.f32 %v3558_v55, %v1436_v10 }
 0x26a   : > { %v1272_v0 = vpop.f32.mrf.mxu2  ;;  %v1382_v56 = vpop.f32.mrf.mxu3 }
 0x26b   : > { %1761 = vmatpush.msrb.mxu2 %v1660_v52  ;;  %v3231_v35 = vadd.f32 %v1382_v56, %v1270_v36  ;;  %v1614_v34 = vpop.f32.mrf.mxu1  ;;  %v1273_v26 = vadd.f32 %v1272_v0, %v3537_v28  ;;  %v1546_v52 = vadd.f32 %v3559_v2, %v1433_v45  ;;  %v1646_v28 = vmax.f32 %v1552_v29, 0.0  ;;  %v3560_v36 = vld [vmem:[#allocation14_spill] sm:$0xff]  ;;  %v3562_v45 = vld [vmem:[#allocation19_spill] sm:$0xff] }
 0x26c   : > { %v1644_v1 = vmax.f32 %v1549_v42, 0.0  ;;  %v3564_v42 = vld [vmem:[#allocation16_spill] sm:$0xff] }
 0x26d   : > { %1762 = vmatpush.msrb.mxu2 %v1658_v47  ;;  %v1501_v41 = vpop.f32.mrf.mxu0  ;;  %v1642_v24 = vmax.f32 %v1546_v52, 0.0  ;;  %v3565_v52 = vld [vmem:[#allocation20_spill] sm:$0xff] }
 0x26e   : > { %v1502_v23 = vadd.f32 %v1501_v41, %v3551_v59 }
 0x26f   : > { %1763 = vmatpush.msrb.mxu2 %v1656_v4 }
 0x270   : > { %v3243_v63 = vadd.f32 %v1614_v34, %v1502_v23 }
 0x271   : > { %1764 = vmatpush.msrb.mxu2 %v1654_v49 }
 0x272   : > { %v1275_v8 = vpop.f32.mrf.mxu2  ;;  %v1385_v57 = vpop.f32.mrf.mxu3 }
 0x273   : > { %1765 = vmatpush.msrb.mxu2 %v1652_v39  ;;  %v3249_v7 = vadd.f32 %v1385_v57, %v1273_v26  ;;  %v1617_v11 = vpop.f32.mrf.mxu1  ;;  %v1276_v14 = vadd.f32 %v1275_v8, %v3551_v59 }
 0x275   : > { %1766 = vmatpush.msrb.mxu2 %v1650_v20  ;;  %v1504_v48 = vpop.f32.mrf.mxu0  ;;  %v3563_v20 = vld [vmem:[#allocation17_spill] sm:$0xff] }
 0x276   : > { %v1505_v38 = vadd.f32 %v1504_v48, %v3560_v36 }
 0x277   : > { %1767 = vmatpush.msrb.mxu2 %v1648_v54 }
 0x278   : > { %v3254_v19 = vadd.f32 %v1617_v11, %v1505_v38 }
 0x279   : > { %1768 = vmatpush.msrb.mxu2 %v1646_v28 }
 0x27a   : > { %v1278_v31 = vpop.f32.mrf.mxu2  ;;  %v1388_v47 = vpop.f32.mrf.mxu3 }
 0x27b   : > { %1769 = vmatpush.msrb.mxu2 %v1644_v1  ;;  %v3257_v0 = vadd.f32 %v1388_v47, %v1276_v14  ;;  %v1279_v56 = vadd.f32 %v1278_v31, %v3560_v36  ;;  %v3262_v6 = vpop.f32.mrf.mxu1  ;;  %v3566_v1 = vld [vmem:[#allocation13_spill] sm:$0xff] }
 0x27d   : > { %1770 = vmatpush.msrb.mxu2 %v1642_v24  ;;  %v3260_v41 = vpop.f32.mrf.mxu0 }
 0x282   : > { %v1281_v34 = vpop.f32.mrf.mxu2  ;;  %v1391_v3 = vpop.f32.mrf.mxu3 }
 0x283   : > { %v1392_v43 = vadd.f32 %v1391_v3, %v1279_v56  ;;  %v3266_v59 = vpop.f32.mrf.mxu1  ;;  %v3567_v56 = vld [vmem:[#allocation15_spill] sm:$0xff] }
 0x284   : > { %v1282_v3 = vadd.f32 %v1281_v34, %v3567_v56  ;;  %v1705_v34 = vld [vmem:[%s3435_s6] sm:$0xff] }
 0x285   : > { %v3264_v62 = vpop.f32.mrf.mxu0  ;;  %1725 = vmatmul.f32.vlgmr.msra.gmra.mxu2 %v1705_v34 }
 0x28a   : > { %v1284_v61 = vpop.f32.mrf.mxu2  ;;  %v1394_v17 = vpop.f32.mrf.mxu3 }
 0x28b   : > { %v3270_v10 = vpop.f32.mrf.mxu1  ;;  %v1285_v14 = vadd.f32 %v1284_v61, %v3566_v1  ;;  %v1687_v61 = vmax.f32 %v3257_v0, 0.0  ;;  %v1679_v0 = vmax.f32 %v3197_v9, 0.0 }
 0x28d   : > { %v3268_v23 = vpop.f32.mrf.mxu0 }
 0x292   : > { %v1287_v12 = vpop.f32.mrf.mxu2  ;;  %v1397_v4 = vpop.f32.mrf.mxu3 }
 0x293   : > { %v3272_v26 = vpop.f32.mrf.mxu1  ;;  %v1288_v28 = vadd.f32 %v1287_v12, %v3565_v52 }
 0x295   : > { %v1516_v50 = vpop.f32.mrf.mxu0 }
 0x296   : > { %v1517_v9 = vadd.f32 %v1516_v50, %v3564_v42 }
 0x29a   : > { %v1290_v5 = vpop.f32.mrf.mxu2  ;;  %v1400_v60 = vpop.f32.mrf.mxu3 }
 0x29b   : > { %v1291_v54 = vadd.f32 %v1290_v5, %v3564_v42  ;;  %v1401_v24 = vadd.f32 %v1400_v60, %v1288_v28  ;;  %v1632_v31 = vpop.f32.mrf.mxu1  ;;  %v1395_v5 = vadd.f32 %v1394_v17, %v1282_v3  ;;  %v1683_v17 = vmax.f32 %v3231_v35, 0.0 }
 0x29d   : > { %v1519_v48 = vpop.f32.mrf.mxu0  ;;  %v1691_v12 = vmax.f32 %v1395_v5, 0.0 }
 0x29e   : > { %v1520_v35 = vadd.f32 %v1519_v48, %v3563_v20 }
 0x2a2   : > { %v1293_v25 = vpop.f32.mrf.mxu2  ;;  %v1403_v49 = vpop.f32.mrf.mxu3 }
 0x2a3   : > { %v1294_v8 = vadd.f32 %v1293_v25, %v3563_v20  ;;  %v1404_v36 = vadd.f32 %v1403_v49, %v1291_v54  ;;  %v1398_v25 = vadd.f32 %v1397_v4, %v1285_v14  ;;  %v1689_v49 = vmax.f32 %v1392_v43, 0.0 }
 0x2a4   : > { %v1685_v4 = vmax.f32 %v3249_v7, 0.0  ;;  %v1707_v7 = vld [vmem:[%s3435_s6 + $0x10] sm:$0x1]  ;;  %v1673_v54 = vmax.f32 %v3158_v18, 0.0  ;;  %v1630_v20 = vadd.f32 %v3272_v26, %v1517_v9  ;;  %v1508_v18 = vadd.f32 %v3260_v41, %v3567_v56  ;;  %v1708_v26 = vld [vmem:[%s3435_s6 + $0x18] sm:$0x1] }
 0x2a5   : > { %1728 = vmatmul.f32.gmra.mxu2 %v1707_v7  ;;  %v1680_v14 = vmax.f32 %v3172_v30, 0.0 }
 0x2a6   : > { %v1621_v28 = vadd.f32 %v3262_v6, %v1508_v18  ;;  %v1686_v6 = vmax.f32 %v3224_v58, 0.0 }
 0x2a8   : > { %v1692_v41 = vmax.f32 %v1621_v28, 0.0 }
 0x2aa   : > { %v1406_v16 = vpop.f32.mrf.mxu3  ;;  %v1296_v44 = vpop.f32.mrf.mxu2 }
 0x2ab   : > { %v1297_v51 = vadd.f32 %v1296_v44, %v3561_v15  ;;  %v1407_v11 = vadd.f32 %v1406_v16, %v1294_v8  ;;  %v1697_v44 = vmax.f32 %v1404_v36, 0.0  ;;  %v1693_v16 = vmax.f32 %v1398_v25, 0.0 }
 0x2ad   : > { %v1699_v47 = vmax.f32 %v1407_v11, 0.0  ;;  %v1633_v11 = vadd.f32 %v1632_v31, %v1520_v35  ;;  %1771 = vmatmul.f32.vlgmr.msrb.gmra.mxu2 %v1705_v34  ;;  %v1813_v34 = vld [vmem:[%s3429_s0] ss:$2 sm:$0x3] }
 0x2ae   : > { %vm1868_vm8 = vcmp.ge.s32.totalorder %v1813_v34, 0  ;;  %vm1869_vm10 = vcmp.lt.s32.totalorder %v1813_v34, 16 }
 0x2af   : > { %v1700_v42 = vmax.f32 %v1633_v11, 0.0  ;;  %vm3360_vm0 = vmand %vm1868_vm8, %vm1869_vm10  ;;  %v1903_v11 = vadd.s32 1, %v1813_v34 }
 0x2b2   : > { %v1409_v13 = vpop.f32.mrf.mxu3  ;;  %v1299_v39 = vpop.f32.mrf.mxu2 }
 0x2b3   : > { %v1300_v21 = vadd.f32 %v1299_v39, %v3562_v45  ;;  %v1410_v57 = vadd.f32 %v1409_v13, %v1297_v51  ;;  %v1695_v13 = vmax.f32 %v1401_v24, 0.0  ;;  %v1522_v39 = vpop.f32.mrf.mxu0  ;;  %v1635_v51 = vpop.f32.mrf.mxu1  ;;  %v1678_v24 = vmax.f32 %v3165_v46, 0.0 }
 0x2b4   : > { %v1523_v8 = vadd.f32 %v1522_v39, %v3561_v15  ;;  %v1514_v15 = vadd.f32 %v3268_v23, %v3565_v52  ;;  %v1698_v52 = vmax.f32 %v1630_v20, 0.0 }
 0x2b5   : > { %v1701_v38 = vmax.f32 %v1410_v57, 0.0  ;;  %v1677_v57 = vmax.f32 %v3177_v22, 0.0  ;;  %v1706_v22 = vld [vmem:[%s3435_s6 + $0x8] sm:$0xff]  ;;  %1774 = vmatmul.f32.gmra.mxu2 %v1707_v7 }
 0x2b6   : > { %v1627_v23 = vadd.f32 %v3270_v10, %v1514_v15  ;;  %v1690_v10 = vmax.f32 %v3254_v19, 0.0  ;;  %v1676_v19 = vmax.f32 %v3151_v40, 0.0 }
 0x2ba   : > { %v1412_v29 = vpop.f32.mrf.mxu3 }
 0x2bb   : > { %v1413_v55 = vadd.f32 %v1412_v29, %v1300_v21  ;;  %v1525_v60 = vpop.f32.mrf.mxu0  ;;  %v1681_v21 = vmax.f32 %v3213_v37, 0.0  ;;  %v1638_v29 = vpop.f32.mrf.mxu1 }
 0x2bc   : > { %v1526_v43 = vadd.f32 %v1525_v60, %v3562_v45  ;;  %v1636_v45 = vadd.f32 %v1635_v51, %v1523_v8 }
 0x2bd   : > { %v1703_v2 = vmax.f32 %v1413_v55, 0.0  ;;  %v1675_v55 = vmax.f32 %v3167_v53, 0.0  ;;  %v1511_v53 = vadd.f32 %v3264_v62, %v3566_v1  ;;  %v1696_v62 = vmax.f32 %v1627_v23, 0.0 }
 0x2be   : > { %v1639_v37 = vadd.f32 %v1638_v29, %v1526_v43  ;;  %v1702_v50 = vmax.f32 %v1636_v45, 0.0  ;;  %v1682_v1 = vmax.f32 %v3189_v32, 0.0 }
 0x2bf   : > { %1732 = vmatpush.msra.mxu3 %v1703_v2  ;;  %v1624_v48 = vadd.f32 %v3266_v59, %v1511_v53  ;;  %v1688_v59 = vmax.f32 %v3243_v63, 0.0  ;;  %v1674_v63 = vmax.f32 %v3144_v27, 0.0 }
 0x2c0   : > { %v1704_v2 = vmax.f32 %v1639_v37, 0.0 }
 0x2c1   : > { %1733 = vmatpush.msra.mxu3 %v1701_v38  ;;  %v1694_v36 = vmax.f32 %v1624_v48, 0.0  ;;  %v1684_v38 = vmax.f32 %v3209_v33, 0.0  ;;  %v2146_v33 = vmov 0.0  }
 0x2c2   : > { %1801 = vst [vmem:[#allocation2] sm:$0xff] %v2146_v33 }
 0x2c3   : > { %1734 = vmatpush.msra.mxu3 %v1699_v47  ;;  %1804 = vst [vmem:[#allocation2 + $0x18] sm:$0xff] %v2146_v33 }
 0x2c4   : > { %1806 = vst [vmem:[#allocation2 + $0x28] sm:$0x1] %v2146_v33 }
 0x2c5   : > { %1735 = vmatpush.msra.mxu3 %v1697_v44  ;;  %1807 = vst [vmem:[#allocation2 + $0x30] sm:$0x1] %v2146_v33 }
 0x2c6   : > { %1808 = vst [vmem:[#allocation2 + $0x38] sm:$0x1] %v2146_v33 }
 0x2c7   : > { %1736 = vmatpush.msra.mxu3 %v1695_v13 }
 0x2c9   : > { %1737 = vmatpush.msra.mxu3 %v1693_v16 }
 0x2cb   : > { %1738 = vmatpush.msra.mxu3 %v1691_v12 }
 0x2cd   : > { %1739 = vmatpush.msra.mxu3 %v1689_v49 }
 0x2cf   : > { %1740 = vmatpush.msra.mxu3 %v1687_v61 }
 0x2d1   : > { %1741 = vmatpush.msra.mxu3 %v1685_v4  ;;  %v3330_v4 = vld [vmem:[%s3429_s0 + $0x1] ss:$2 sm:$0x3] }
 0x2d2   : > { %v3333_v60 = vadd.s32 4294967295, %v3330_v4  ;;  %vm3457_vm9 = vcmp.ge.s32.totalorder %v3330_v4, 0  ;;  %v3347_v29 = vadd.s32 1, %v3330_v4  ;;  %vm1839_vm15 = vcmp.lt.s32.totalorder %v3330_v4, 16 }
 0x2d3   : > { %1742 = vmatpush.msra.mxu3 %v1683_v17  ;;  %v1817_v17 = vadd.s32 4294967295, %v1813_v34  ;;  %vm1884_vm8 = vmand %vm3360_vm0, %vm3457_vm9 }
 0x2d4   : > { %vm1822_vm4 = vcmp.ge.s32.totalorder %v3333_v60, 0  ;;  %vm1824_vm7 = vcmp.lt.s32.totalorder %v3333_v60, 16  ;;  %vm1855_vm10 = vcmp.lt.s32.totalorder %v3347_v29, 16 }
 0x2d5   : > { %1743 = vmatpush.msra.mxu3 %v1681_v21  ;;  %vm1818_vm2 = vcmp.ge.s32.totalorder %v1817_v17, 0  ;;  %vm1819_vm3 = vcmp.lt.s32.totalorder %v1817_v17, 16 }
 0x2d6   : > { %vm3336_vm5 = vmand %vm1818_vm2, %vm1819_vm3  ;;  %vm1853_vm2 = vcmp.ge.s32.totalorder %v3347_v29, 0 }
 0x2d7   : > { %1744 = vmatpush.msra.mxu3 %v1679_v0  ;;  %vm1823_vm6 = vmand %vm3336_vm5, %vm1822_vm4 }
 0x2d8   : > { %vm1838_vm12 = vmand %vm3336_vm5, %vm3457_vm9 }
 0x2d9   : > { %1745 = vmatpush.msra.mxu3 %v1677_v57  ;;  %vm3355_vm14 = vmand %vm1823_vm6, %vm1824_vm7  ;;  %vm1861_vm6 = vcmask 121856  }
 0x2da   : > { %vm1840_vm1 = vmand %vm1838_vm12, %vm1839_vm15 }
 0x2db   : > { %1746 = vmatpush.msra.mxu3 %v1675_v55  ;;  %vm1854_vm3 = vmand %vm3336_vm5, %vm1853_vm2  ;;  %vm1877_vm5 = vcmask 7168  }
 0x2dc   : > { %vm1856_vm12 = vmand %vm1854_vm3, %vm1855_vm10 }
 0x2dd   : > { %1747 = vmatpush.msra.mxu3 %v1673_v54  ;;  %vm1890_vm3 = vmand %vm3360_vm0, %vm1853_vm2 }
 0x2de   : > { %1748 = vmatmul.f32.vlgmr.msra.gmra.mxu3 %v1706_v22 }
 0x2df   : > { %1778 = vmatpush.msrb.mxu3 %v1704_v2 }
 0x2e1   : > { %1779 = vmatpush.msrb.mxu3 %v1702_v50 }
 0x2e3   : > { %1780 = vmatpush.msrb.mxu3 %v1700_v42 }
 0x2e5   : > { %1781 = vmatpush.msrb.mxu3 %v1698_v52 }
 0x2e6   : > { %1751 = vmatmul.f32.gmra.mxu3 %v1708_v26 }
 0x2e7   : > { %1782 = vmatpush.msrb.mxu3 %v1696_v62 }
 0x2e9   : > { %1783 = vmatpush.msrb.mxu3 %v1694_v36 }
 0x2eb   : > { %1784 = vmatpush.msrb.mxu3 %v1692_v41 }
 0x2ed   : > { %1785 = vmatpush.msrb.mxu3 %v1690_v10 }
 0x2ef   : > { %1786 = vmatpush.msrb.mxu3 %v1688_v59 }
 0x2f1   : > { %1787 = vmatpush.msrb.mxu3 %v1686_v6 }
 0x2f3   : > { %1788 = vmatpush.msrb.mxu3 %v1684_v38 }
 0x2f5   : > { %1789 = vmatpush.msrb.mxu3 %v1682_v1 }
 0x2f7   : > { %1790 = vmatpush.msrb.mxu3 %v1680_v14 }
 0x2f9   : > { %1791 = vmatpush.msrb.mxu3 %v1678_v24 }
 0x2fb   : > { %1792 = vmatpush.msrb.mxu3 %v1676_v19 }
 0x2fd   : > { %1793 = vmatpush.msrb.mxu3 %v1674_v63 }
 0x2fe   : > { %1794 = vmatmul.f32.vlgmr.msrb.gmra.mxu3 %v1706_v22 }
 0x306   : > { %1797 = vmatmul.f32.gmra.mxu3 %v1708_v26 }
 0x308   : > { %v1726_v30 = vpop.f32.mrf.mxu2 }
 0x328   : > { %v1729_v46 = vpop.f32.mrf.mxu2 }
 0x330   : > { %v1772_v47 = vpop.f32.mrf.mxu2 }
 0x338   : > { %v1775_v3 = vpop.f32.mrf.mxu2 }
 0x361   : > { %v1749_v32 = vpop.f32.mrf.mxu3 }
 0x362   : > { %v1750_v58 = vadd.f32 %v1749_v32, %v1726_v30 }
 0x364   : > { %1809 = vst [vmem:[#allocation2 + $0x8] sm:$0xff] %v1750_v58 }
 0x369   : > { %v1752_v31 = vpop.f32.mrf.mxu3 }
 0x36a   : > { %v1753_v40 = vadd.f32 %v1752_v31, %v1729_v46 }
 0x36c   : > { %1811 = vst [vmem:[#allocation2 + $0x28] sm:$0x1] %v1753_v40 }
 0x381   : > { %v1795_v27 = vpop.f32.mrf.mxu3 }
 0x382   : > { %v1796_v56 = vadd.f32 %v1795_v27, %v1772_v47  ;;  %v1945_v27 = vstv %s1944_s16 }
 0x384   : > { %1810 = vst [vmem:[#allocation2 + $0x10] sm:$0xff] %v1796_v56 }
 0x389   : > { %v1798_v25 = vpop.f32.mrf.mxu3 }
 0x38a   : > { %v1799_v44 = vadd.f32 %v1798_v25, %v1775_v3 }
 0x38b   : > { %v1816_v5 = vld [vmem:[#allocation2] ss:$8 sm:$0x7]  ;;  %v1851_v13 = vld [vmem:[#allocation2 + $0x2] ss:$8 sm:$0x7] }
 0x38c   : > { %1827 = vrot.lane.b32.xlu1 %v1816_v5, %s2147_s25  ;;  %1858 = vrot.lane.b32.xlu0 %v1851_v13, %s2148_s26  ;;  %v1836_v16 = vld [vmem:[#allocation2 + $0x1] ss:$8 sm:$0x7]  ;;  %1812 = vst [vmem:[#allocation2 + $0x30] sm:$0x1] %v1799_v44 }
 0x38d   : > { %1842 = vrot.lane.b32.xlu2 %v1836_v16, %s2149_s27  ;;  %v1867_v39 = vld [vmem:[#allocation2 + $0x3] ss:$8 sm:$0x7]  ;;  %v1902_v12 = vld [vmem:[#allocation2 + $0xe] ss:$8 sm:$0x7] }
 0x38e   : > { %v1889_v49 = vld [vmem:[#allocation2 + $0xd] ss:$8 sm:$0x7]  ;;  %v1919_v51 = vld [vmem:[#allocation2 + $0xf] ss:$8 sm:$0x7] }
 0x38f   : > { %v1883_v62 = vld [vmem:[#allocation2 + $0xc] ss:$8 sm:$0x3] }
 0x393   : > { %v1932_v61 = vld [vmem:[#allocation2 + $0x28] ss:$8 sm:$0x7] }
 0x394   : > { %1874 = vrot.lane.b32.xlu1 %v1867_v39, %s2150_s28  ;;  %1910 = vrot.lane.b32.xlu0 %v1902_v12, %s2151_s9 }
 0x395   : > { %1893 = vrot.lane.b32.xlu2 %v1889_v49, %s2152_s10  ;;  %v1966_v49 = vlaneseq }
 0x39c   : > { %1923 = vrot.lane.b32.xlu1 %v1919_v51, %s2153_s7 }
 0x39d   : > { %1936 = vrot.lane.b32.xlu2 %v1932_v61, %s2154_s11 }
 0x3e7   : > { %v1843_v21 = vpop.permute.xlu2 %1842 }
 0x3e8   : > { %v1844_v0 = vrot.slane %v1843_v21, 1 }
 0x3ea   : > { %v1846_v45 = vsel %vm1845_vm13, %v1843_v21, %v1844_v0  ;;  %vm3386_vm13 = vmand %vm1884_vm8, %vm1839_vm15 }
 0x3eb   : > { %v1848_v2 = vsel %vm1840_vm1, %v1846_v45, 0.0  ;;  %vm1905_vm1 = vcmp.lt.s32.totalorder %v1903_v11, 16  ;;  %v1886_v38 = vsel %vm3386_vm13, %v1883_v62, 0.0 }
 0x3ef   : > { %v1894_v55 = vpop.permute.xlu2 %1893 }
 0x3f0   : > { %v1895_v42 = vrot.slane %v1894_v55, 1 }
 0x3f7   : > { %v1937_v10 = vpop.permute.xlu2 %1936 }
 0x3f8   : > { %v1938_v24 = vrot.slane %v1937_v10, 1 }
 0x3fe   : > { %v1828_v8 = vpop.permute.xlu1 %1827  ;;  %v1859_v7 = vpop.permute.xlu0 %1858 }
 0x3ff   : > { %v1829_v35 = vrot.slane %v1828_v8, 1  ;;  %v1860_v54 = vrot.slane %v1859_v7, 1 }
 0x401   : > { %v1831_v9 = vsel %vm1830_vm11, %v1828_v8, %v1829_v35  ;;  %vm1871_vm11 = vmand %vm3360_vm0, %vm1822_vm4  ;;  %v1862_v53 = vsel %vm1861_vm6, %v1859_v7, %v1860_v54  ;;  %vm1896_vm6 = vcmask 1039360  }
 0x402   : > { %v1833_v15 = vsel %vm3355_vm14, %v1831_v9, 0.0  ;;  %vm1904_vm14 = vcmp.ge.s32.totalorder %v1903_v11, 0  ;;  %vm1872_vm9 = vmand %vm1871_vm11, %vm1824_vm7  ;;  %v1864_v48 = vsel %vm1856_vm12, %v1862_v53, 0.0  ;;  %vm1913_vm12 = vcmask 924672  }
 0x403   : > { %v1849_v22 = vadd.f32 %v1848_v2, %v1833_v15  ;;  %vm3396_vm8 = vmand %vm1904_vm14, %vm1905_vm1  ;;  %v1897_v6 = vsel %vm1896_vm6, %v1894_v55, %v1895_v42  ;;  %vm1926_vm14 = vcmask 916480   ;;  %vm1939_vm1 = vcmask 908288  }
 0x404   : > { %vm1907_vm11 = vmand %vm3396_vm8, %vm1822_vm4  ;;  %v1940_v31 = vsel %vm1939_vm1, %v1937_v10, %v1938_v24 }
 0x405   : > { %v1865_v52 = vadd.f32 %v1864_v48, %v1849_v22  ;;  %vm1891_vm0 = vmand %vm1890_vm3, %vm1855_vm10 }
 0x406   : > { %v1875_v20 = vpop.permute.xlu1 %1874  ;;  %v1911_v18 = vpop.permute.xlu0 %1910  ;;  %vm1908_vm4 = vmand %vm1907_vm11, %vm1824_vm7  ;;  %v1899_v19 = vsel %vm1891_vm0, %v1897_v6, 0.0 }
 0x407   : > { %v1876_v23 = vrot.slane %v1875_v20, 1  ;;  %v1912_v36 = vrot.slane %v1911_v18, 1  ;;  %vm1933_vm13 = vmand %vm3396_vm8, %vm1853_vm2 }
 0x408   : > { %vm1934_vm7 = vmand %vm1933_vm13, %vm1855_vm10  ;;  %vm1968_vm10 = vcmp.lt.s32.totalorder %v1966_v49, 256 }
 0x409   : > { %v1878_v28 = vsel %vm1877_vm5, %v1875_v20, %v1876_v23  ;;  %vm3578_vm5 = vcmp.ge.s32.totalorder %v3330_v4, 0  ;;  %v1914_v14 = vsel %vm1913_vm12, %v1911_v18, %v1912_v36  ;;  %v1942_v56 = vsel %vm1934_vm7, %v1940_v31, 0.0 }
 0x40a   : > { %v1880_v41 = vsel %vm1872_vm9, %v1878_v28, 0.0  ;;  %vm1920_vm9 = vmand %vm3396_vm8, %vm3578_vm5  ;;  %v1916_v32 = vsel %vm1908_vm4, %v1914_v14, 0.0 }
 0x40b   : > { %v1881_v59 = vadd.f32 %v1880_v41, %v1865_v52  ;;  %vm1921_vm3 = vmand %vm1920_vm9, %vm1839_vm15 }
 0x40d   : > { %v1887_v1 = vadd.f32 %v1886_v38, %v1881_v59 }
 0x40e   : > { %v1924_v63 = vpop.permute.xlu1 %1923 }
 0x40f   : > { %v1900_v33 = vadd.f32 %v1899_v19, %v1887_v1  ;;  %v1925_v30 = vrot.slane %v1924_v63, 1 }
 0x411   : > { %v1917_v58 = vadd.f32 %v1916_v32, %v1900_v33  ;;  %v1927_v46 = vsel %vm1926_vm14, %v1924_v63, %v1925_v30 }
 0x412   : > { %v1929_v40 = vsel %vm1921_vm3, %v1927_v46, 0.0 }
 0x413   : > { %v1930_v47 = vadd.f32 %v1929_v40, %v1917_v58 }
 0x415   : > { %v1943_v3 = vadd.f32 %v1942_v56, %v1930_v47 }
 0x417   : > { %v1946_v25 = vadd.f32 %v1945_v27, %v1943_v3 }
 0x419   : > { %v2098_v44 = vmul.f32 -1.442695, %v1946_v25 }
 0x41b   : > { %2133 = vpow2.f32 %v2098_v44 }
 0x421   : > { %v2134_v5 = vpop.eup %2133 }
 0x422   : > { %v1950_v13 = vadd.f32 1.0, %v2134_v5 }
 0x424   : > { %2135 = vrcp.f32 %v1950_v13  ;;  %v1962_v51 = vand.u32 2147483648, %v1950_v13  ;;  %v1960_v34 = vand.u32 2147483647, %v1950_v13  ;;  %vm1956_vm2 = vweird.f32 %v1950_v13 }
 0x426   : > { %v1963_v17 = vor.u32 1.1754944e-38, %v1962_v51  ;;  %vm1961_vm8 = vcmp.eq.f32.partialorder %v1960_v34, 8.507059e+37 }
 0x42a   : > { %v2136_v16 = vpop.eup %2135 }
 0x42b   : > { %v1952_v39 = vmul.f32 %v2136_v16, %v1950_v13  ;;  %vm1957_vm15 = vweird.f32 %v2136_v16 }
 0x42c   : > { %vm1958_vm6 = vmor %vm1956_vm2, %vm1957_vm15 }
 0x42d   : > { %v1953_v12 = vsub.f32 1.0, %v1952_v39 }
 0x42f   : > { %v1954_v61 = vmul.f32 %v2136_v16, %v1953_v12 }
 0x431   : > { %v1955_v4 = vadd.f32 %v2136_v16, %v1954_v61 }
 0x433   : > { %v1959_v60 = vsel %vm1958_vm6, %v2136_v16, %v1955_v4 }
 0x434   : > { %v1964_v21 = vsel %vm1961_vm8, %v1963_v17, %v1959_v60 }
 0x435   : > { %1970 = vst.msk [vmem:[%s304_s20] sm:$0x3] %vm1968_vm10, %v1964_v21 }
 0x436 PF: > { %s19_s29 = sadd.s32 1, %s2143_s29  }
 0x437   : > { %p16_p4 = scmp.ge.s32.totalorder %s19_s29, 4  }
 0x439   :  { %18 = sbr.rel (!%p16_p4) target bundleno = 2 (0x2), region = 91 }

</bundles_post_ra>
